<compile_context>
chip_gen: v7x
topology: tpu7x:2x2x1
jax: 0.10.0
libtpu: 0.0.40
codegen_flags: <defaults>
</compile_context>

<pallas_src>
import math

import jax
import jax.numpy as jnp
from jax.experimental import pallas as pl
from jax.experimental.pallas import tpu as pltpu

# ---------------- model dims (small, consistent with the forward) ----------------
B = 2          # batch
CIN = 3        # image channels (NCHW input)
IMG = 16       # image H = W
PATCH = 4      # patch size
NTOK = (IMG // PATCH) ** 2          # 16 tokens
PDIM = CIN * PATCH * PATCH          # 48 flattened patch dim
DMODEL = 32    # feature / slot dim
NSLOTS = 4     # number of slots
NCODES = 8     # codebook size
DHID = 64      # decoder hidden dim
FEEDBACK_PROB = 1.0

# ---------------- packed weight slab layout (one 128-lane, 8-row-aligned slab) ----
SLAB_LANES = 128


def _round8(n):
    return ((n + 7) // 8) * 8


_SEGS = [
    ("w_pe", PDIM, DMODEL),
    ("b_pe", 1, DMODEL),
    ("slot_mu", NSLOTS, DMODEL),
    ("wq", DMODEL, DMODEL),
    ("wkv", DMODEL, 2 * DMODEL),
    ("wu", DMODEL, DMODEL),
    ("codebook", NCODES, DMODEL),
    ("cb_sq", 1, NCODES),
    ("w1", DMODEL, DHID),
    ("b1", 1, DHID),
    ("w2", DHID, DMODEL + 1),
    ("b2", 1, DMODEL + 1),
    ("expand", B * NSLOTS * NTOK, B * NSLOTS),   # one-hot slot->row expansion
    ("pos_tiled", B * NSLOTS * NTOK, DMODEL),    # pos tiled over B*S
]

_OFFSETS = {}
_r = 0
for _name, _rows, _cols in _SEGS:
    _OFFSETS[_name] = (_r, _rows, _cols)
    _r += _round8(_rows)
SLAB_ROWS = _r                                   # 544 rows, 8-aligned segments

# lane-padded output slab layout
TOK_W = 128                                       # [feats | recon | pad]
SLOT_USED = 3 * DMODEL + 3 * NTOK + 2             # [pre|post|code|apre|apost|mask|idx|commit]
SLOT_W = 256                                      # padded to a multiple of 128


# ================================ fused kernel ================================

def fused_kernel(patches_ref, w_ref, tok_ref, slot_ref):
    f32 = jnp.float32
    scale = 1.0 / math.sqrt(DMODEL)

    def seg(name):
        r0, rows, cols = _OFFSETS[name]
        return w_ref[r0:r0 + rows, :cols]         # static (8-aligned) slab slice

    # -------- feature_extractor: patch embedding (conv-as-matmul) --------
    feats = (jnp.dot(patches_ref[...], seg("w_pe"),
                     preferred_element_type=f32) + seg("b_pe"))          # [B*N, D]

    # -------- shared K/V: packed [wk|wv], computed once, reused by both passes ----
    kv = jnp.dot(feats, seg("wkv"), preferred_element_type=f32)          # [B*N, 2D]
    k_b = [kv[b * NTOK:(b + 1) * NTOK, :DMODEL] for b in range(B)]       # [N, D] each
    v_b = [kv[b * NTOK:(b + 1) * NTOK, DMODEL:] for b in range(B)]       # [N, D] each

    slot_mu = seg("slot_mu")                                             # [S, D]
    wq = seg("wq")
    wu = seg("wu")

    def grouping(q_rows, bias_rows):
        # one slot-attention iteration; batch statically unrolled (B tiny),
        # all math 2-D; the wu projection is done once on all B*S rows.
        attn_list, log_list, upd_list = [], [], []
        for b in range(B):
            q = q_rows[b * NSLOTS:(b + 1) * NSLOTS, :]                   # [S, D]
            logits = jax.lax.dot_general(
                q, k_b[b], (((1,), (1,)), ((), ())),
                preferred_element_type=f32) * scale                      # [S, N]
            if bias_rows is not None:
                logits = logits + bias_rows[b]
            lmax = jnp.max(logits, axis=0, keepdims=True)                # [1, N]
            e = jnp.exp(logits - lmax)
            ssum = jnp.sum(e, axis=0, keepdims=True)                     # [1, N]
            attn = e / ssum                                              # softmax over slots
            log_attn = (logits - lmax) - jnp.log(ssum)                   # exact log-softmax
            attn_n = attn / (jnp.sum(attn, axis=1, keepdims=True) + 1e-8)
            upd = jnp.dot(attn_n, v_b[b], preferred_element_type=f32)    # [S, D]
            attn_list.append(attn)
            log_list.append(log_attn)
            upd_list.append(upd)
        upd_all = jnp.concatenate(upd_list, axis=0)                      # [B*S, D]
        obj = jnp.dot(upd_all, wu, preferred_element_type=f32)           # [B*S, D]
        return obj, jnp.concatenate(attn_list, axis=0), log_list

    # -------- perceptual grouping, pre pass --------
    # code = 0; the uniform pre-attn log-bias is constant along the slot (softmax)
    # axis and is therefore dropped.
    q_pre = jnp.dot(slot_mu, wq, preferred_element_type=f32)             # [S, D]
    q_pre_rows = jnp.concatenate([q_pre] * B, axis=0)                    # [B*S, D]
    pre_obj, attn_pre, log_attn_pre = grouping(q_pre_rows, None)

    # -------- pool: nearest-codebook VQ + commit loss (MXU cross term only) --------
    cb = seg("codebook")                                                 # [K, D]
    cb_sq = seg("cb_sq")                                                 # [1, K] host-precomputed
    cross = jax.lax.dot_general(pre_obj, cb, (((1,), (1,)), ((), ())),
                                preferred_element_type=f32)              # [M, K]
    score = cb_sq - 2.0 * cross          # = ||obj - cb||^2 minus a per-row constant
    smin = jnp.min(score, axis=1, keepdims=True)                         # [M, 1]
    kiota = jax.lax.broadcasted_iota(jnp.int32, (B * NSLOTS, NCODES), 1)
    idx = jnp.min(jnp.where(score <= smin, kiota, NCODES),
                  axis=1, keepdims=True)                                 # [M, 1] (lowest index on ties)
    onehot = (kiota == idx).astype(f32)                                  # [M, K]
    code = jnp.dot(onehot, cb, preferred_element_type=f32)               # [M, D]
    cdiff = code - pre_obj
    commit = jnp.sum(cdiff * cdiff, keepdims=True)                       # [1, 1] raw sum (eval-only forward)

    # -------- perceptual grouping, feedback pass --------
    # IA3 gate by pooled code, biased by log pre-pass attributions; K/V reused.
    slot_rows = jnp.concatenate([slot_mu] * B, axis=0)                   # [B*S, D]
    q_fb = jnp.dot(slot_rows * (1.0 + code), wq,
                   preferred_element_type=f32)                           # [B*S, D]
    post_obj, attn_post, _ = grouping(q_fb, log_attn_pre)

    # -------- object decoder: spatial-broadcast MLP, two big matmuls --------
    # z built with one MXU push (one-hot expansion) + host-tiled pos: no XLU churn.
    z = (jnp.dot(seg("expand"), post_obj, preferred_element_type=f32)
         + seg("pos_tiled"))                                             # [B*S*N, D]
    h = jnp.maximum(
        jnp.dot(z, seg("w1"), preferred_element_type=f32) + seg("b1"),
        0.0)                                                             # [B*S*N, H]
    pa = (jnp.dot(h, seg("w2"), preferred_element_type=f32)
          + seg("b2"))                                                   # [B*S*N, D+1] ([patch|alpha])
    p_full = pa[:, :DMODEL]
    a_full = pa[:, DMODEL:DMODEL + 1]

    # fused alpha-softmax combine: one [N,S] tile per batch, single exp/sum/divide
    recon_parts, mask_parts = [], []
    for b in range(B):                     # static unroll; combine is tiny VPU work
        base = b * NSLOTS * NTOK
        a_mat = jnp.concatenate(
            [a_full[base + s * NTOK: base + (s + 1) * NTOK, :]
             for s in range(NSLOTS)], axis=1)                            # [N, S]
        amax = jnp.max(a_mat, axis=1, keepdims=True)
        e_mat = jnp.exp(a_mat - amax)
        wnorm = e_mat / jnp.sum(e_mat, axis=1, keepdims=True)            # [N, S]
        rec = None
        for s in range(NSLOTS):
            p_s = p_full[base + s * NTOK: base + (s + 1) * NTOK, :]      # [N, D]
            contrib = wnorm[:, s:s + 1] * p_s
            rec = contrib if rec is None else rec + contrib
        recon_parts.append(rec)                                          # [N, D]
        mask_parts.append(wnorm.T)                                       # [S, N]
    recon = jnp.concatenate(recon_parts, axis=0)                         # [B*N, D]
    masks = jnp.concatenate(mask_parts, axis=0)                          # [B*S, N]

    # -------- lane-dense, 128-multiple-padded output slabs (2 unmasked stores) ----
    tok_pad = jnp.zeros((B * NTOK, TOK_W - 2 * DMODEL), f32)
    tok_ref[...] = jnp.concatenate([feats, recon, tok_pad], axis=1)      # [B*N, 128]

    slot_pad = jnp.zeros((B * NSLOTS, SLOT_W - SLOT_USED), f32)
    slot_ref[...] = jnp.concatenate(
        [pre_obj, post_obj, code, attn_pre, attn_post, masks,
         idx.astype(f32), jnp.broadcast_to(commit, (B * NSLOTS, 1)),
         slot_pad], axis=1)                                              # [B*S, 256]


# ================================ wrapper ================================

_FLOPS = 1_500_000        # rough total MXU flops (see derivation in review notes)
_TRANSCENDENTALS = 512
_BYTES = (SLAB_ROWS * SLAB_LANES + B * NTOK * PDIM
          + B * NTOK * TOK_W + B * NSLOTS * SLOT_W) * 4


def fused_forward_pallas(patches, weight_slab):
    def vm(arr):
        return pl.BlockSpec(arr.shape, lambda i: (0, 0))

    return pl.pallas_call(
        fused_kernel,
        out_shape=(jax.ShapeDtypeStruct((B * NTOK, TOK_W), jnp.float32),
                   jax.ShapeDtypeStruct((B * NSLOTS, SLOT_W), jnp.float32)),
        grid=(1,),
        in_specs=[vm(patches), vm(weight_slab)],
        out_specs=(pl.BlockSpec((B * NTOK, TOK_W), lambda i: (0, 0)),
                   pl.BlockSpec((B * NSLOTS, SLOT_W), lambda i: (0, 0))),
        compiler_params=pltpu.CompilerParams(
            dimension_semantics=("arbitrary",)),
        cost_estimate=pl.CostEstimate(flops=_FLOPS,
                                      transcendentals=_TRANSCENDENTALS,
                                      bytes_accessed=_BYTES),
    )(patches, weight_slab)


# ================================ params + forward ================================

def init_params(key):
    ks = jax.random.split(key, 10)

    def rnd(k, shape, scale):
        return scale * jax.random.normal(k, shape, jnp.float32)

    return {
        "w_pe": rnd(ks[0], (PDIM, DMODEL), 1.0 / math.sqrt(PDIM)),
        "b_pe": jnp.zeros((1, DMODEL), jnp.float32),
        "slot_mu": rnd(ks[1], (NSLOTS, DMODEL), 1.0),
        "wq": rnd(ks[2], (DMODEL, DMODEL), 1.0 / math.sqrt(DMODEL)),
        "wk": rnd(ks[3], (DMODEL, DMODEL), 1.0 / math.sqrt(DMODEL)),
        "wv": rnd(ks[4], (DMODEL, DMODEL), 1.0 / math.sqrt(DMODEL)),
        "wu": rnd(ks[5], (DMODEL, DMODEL), 1.0 / math.sqrt(DMODEL)),
        "codebook": rnd(ks[6], (NCODES, DMODEL), 1.0),
        "pos": rnd(ks[7], (NTOK, DMODEL), 0.02),
        "w1": rnd(ks[8], (DMODEL, DHID), 1.0 / math.sqrt(DMODEL)),
        "b1": jnp.zeros((1, DHID), jnp.float32),
        "w2p": rnd(ks[9], (DHID, DMODEL), 1.0 / math.sqrt(DHID)),
        "b2p": jnp.zeros((1, DMODEL), jnp.float32),
        "w2a": rnd(jax.random.fold_in(ks[9], 1), (DHID, 1), 1.0 / math.sqrt(DHID)),
        "b2a": jnp.zeros((1, 1), jnp.float32),
    }


def pack_weight_slab(params):
    """Pack all params (plus derived constants) into one [SLAB_ROWS, 128] slab.

    Done on the host / XLA side (free under jit); kernel slices with static offsets.
    """
    pieces = {
        "w_pe": params["w_pe"],
        "b_pe": params["b_pe"],
        "slot_mu": params["slot_mu"],
        "wq": params["wq"],
        "wkv": jnp.concatenate([params["wk"], params["wv"]], axis=1),
        "wu": params["wu"],
        "codebook": params["codebook"],
        "cb_sq": jnp.sum(params["codebook"] * params["codebook"],
                         axis=1, keepdims=True).T,                        # [1, K]
        "w1": params["w1"],
        "b1": params["b1"],
        "w2": jnp.concatenate([params["w2p"], params["w2a"]], axis=1),
        "b2": jnp.concatenate([params["b2p"], params["b2a"]], axis=1),
        "expand": jnp.repeat(jnp.eye(B * NSLOTS, dtype=jnp.float32),
                             NTOK, axis=0),                               # [B*S*N, B*S]
        "pos_tiled": jnp.tile(params["pos"], (B * NSLOTS, 1)),            # [B*S*N, D]
    }
    slab = jnp.zeros((SLAB_ROWS, SLAB_LANES), jnp.float32)
    for name, (r0, rows, cols) in _OFFSETS.items():
        slab = slab.at[r0:r0 + rows, :cols].set(pieces[name])
    return slab


def forward(params, image, batch_size):
    # ---- feature_extractor(image): patchify (NCHW) -> token-major patches ----
    b, c, h, w = image.shape
    nh, nw = h // PATCH, w // PATCH
    n = nh * nw
    patches = (image.reshape(b, c, nh, PATCH, nw, PATCH)
               .transpose(0, 2, 4, 1, 3, 5)
               .reshape(b * n, c * PATCH * PATCH))

    weight_slab = pack_weight_slab(params)

    tok, slot = fused_forward_pallas(patches, weight_slab)

    d, s = DMODEL, NSLOTS
    feats = tok[:, :d].reshape(b, n, d)
    recon = tok[:, d:2 * d].reshape(b, n, d)
    pre_obj = slot[:, 0:d].reshape(b, s, d)
    post_obj = slot[:, d:2 * d].reshape(b, s, d)
    c0 = 3 * d
    pre_attr = slot[:, c0:c0 + n].reshape(b, s, n)
    post_attr = slot[:, c0 + n:c0 + 2 * n].reshape(b, s, n)
    masks = slot[:, c0 + 2 * n:c0 + 3 * n].reshape(b, s, n)
    pool_indices = slot[:, c0 + 3 * n].astype(jnp.int32).reshape(b, s)
    commit_loss = slot[0, c0 + 3 * n + 1]

    # ---- conditioning(batch_size): learned slot init broadcast over batch ----
    conditioning = jnp.broadcast_to(params["slot_mu"][None],
                                    (batch_size, NSLOTS, DMODEL))

    # ---- feedback gate (eval mode: feedback_prob > 0) ----
    # TODO(synk): training-time torch.rand(1) < feedback_prob Bernoulli gate not
    # reproduced (eval path only); the fused kernel always evaluates the feedback
    # branch, the gate just selects which objects/attributions are reported.
    if FEEDBACK_PROB > 0:
        used_obj, used_attr = post_obj, post_attr
    else:
        used_obj, used_attr = pre_obj, pre_attr

    # TODO(synk): torch.isnan(...).any() + ipdb breakpoint is a debug hook, not reproduced.

    return {
        "feature_extractor_features": feats,
        "post_feature_extractor_features": feats,
        "conditioning": conditioning,
        "perceptual_grouping_objects": pre_obj,
        "perceptual_grouping_attributions": pre_attr,
        "post_perceptual_grouping_objects": used_obj,
        "post_perceptual_grouping_attributions": used_attr,
        "object_decoder_reconstruction": recon,
        "object_decoder_masks": masks,
        "pool_indices": pool_indices,
        "commit_loss": commit_loss,
        "feedback_prob": FEEDBACK_PROB,
    }


if __name__ == "__main__":
    key = jax.random.PRNGKey(0)
    k_img, k_par = jax.random.split(key)
    image = jax.random.normal(k_img, (B, CIN, IMG, IMG), jnp.float32)
    params = init_params(k_par)

    fwd = jax.jit(forward, static_argnames=("batch_size",))
    out = fwd(params, image, batch_size=B)
    jax.block_until_ready(out["object_decoder_reconstruction"])
    jax.block_until_ready(out["commit_loss"])
    jax.block_until_ready(out["pool_indices"])
    print("KERNEL_OK")
</pallas_src>

<mosaic_0001>
module attributes {stable_mosaic.version = 11 : i64} {
  func.func @fused_kernel(%arg0: i32, %arg1: memref<32x48xf32, #tpu.memory_space<vmem>>, %arg2: memref<544x128xf32, #tpu.memory_space<vmem>>, %arg3: memref<32x128xf32, #tpu.memory_space<vmem>>, %arg4: memref<8x256xf32, #tpu.memory_space<vmem>>) attributes {dimension_semantics = [#tpu.dimension_semantics<arbitrary>], iteration_bounds = array<i64: 1>, scalar_prefetch = 0 : i64, scratch_operands = 0 : i64, tpu.core_type = #tpu.core_type<tc>, window_params = [{pipeline_mode = #tpu.pipeline_mode<synchronous>, transform_indices = @transform_0, window_bounds = array<i64: 32, 48>}, {pipeline_mode = #tpu.pipeline_mode<synchronous>, transform_indices = @transform_1, window_bounds = array<i64: 544, 128>}, {pipeline_mode = #tpu.pipeline_mode<synchronous>, transform_indices = @transform_2, window_bounds = array<i64: 32, 128>}, {pipeline_mode = #tpu.pipeline_mode<synchronous>, transform_indices = @transform_3, window_bounds = array<i64: 8, 256>}]} {
    %c0 = arith.constant 0 : index
    %c0_0 = arith.constant 0 : index
    %0 = vector.load %arg1[%c0, %c0_0] : memref<32x48xf32, #tpu.memory_space<vmem>>, vector<32x48xf32>
    %c0_1 = arith.constant 0 : index
    %c0_2 = arith.constant 0 : index
    %1 = vector.load %arg2[%c0_1, %c0_2] : memref<544x128xf32, #tpu.memory_space<vmem>>, vector<48x32xf32>
    %cst = arith.constant dense<0.000000e+00> : vector<32x32xf32>
    %2 = tpu.matmul %0, %1, %cst {dimension_numbers = #tpu.dot_dimension_numbers<[1], [0], [0], [1], [0, 0, 1, 1], [], []>} : vector<32x48xf32>, vector<48x32xf32>, vector<32x32xf32> -> vector<32x32xf32>
    %c48 = arith.constant 48 : index
    %c0_3 = arith.constant 0 : index
    %3 = vector.load %arg2[%c48, %c0_3] : memref<544x128xf32, #tpu.memory_space<vmem>>, vector<1x32xf32>
    %4 = vector.broadcast %3 : vector<1x32xf32> to vector<32x32xf32>
    %5 = arith.addf %2, %4 : vector<32x32xf32>
    %c96 = arith.constant 96 : index
    %c0_4 = arith.constant 0 : index
    %6 = vector.load %arg2[%c96, %c0_4] : memref<544x128xf32, #tpu.memory_space<vmem>>, vector<32x64xf32>
    %cst_5 = arith.constant dense<0.000000e+00> : vector<32x64xf32>
    %7 = tpu.matmul %5, %6, %cst_5 {dimension_numbers = #tpu.dot_dimension_numbers<[1], [0], [0], [1], [0, 0, 1, 1], [], []>} : vector<32x32xf32>, vector<32x64xf32>, vector<32x64xf32> -> vector<32x64xf32>
    %8 = vector.extract_strided_slice %7 {offsets = [0, 0], sizes = [16, 32], strides = [1, 1]} : vector<32x64xf32> to vector<16x32xf32>
    %9 = vector.extract_strided_slice %7 {offsets = [16, 0], sizes = [16, 32], strides = [1, 1]} : vector<32x64xf32> to vector<16x32xf32>
    %10 = vector.extract_strided_slice %7 {offsets = [0, 32], sizes = [16, 32], strides = [1, 1]} : vector<32x64xf32> to vector<16x32xf32>
    %11 = vector.extract_strided_slice %7 {offsets = [16, 32], sizes = [16, 32], strides = [1, 1]} : vector<32x64xf32> to vector<16x32xf32>
    %c56 = arith.constant 56 : index
    %c0_6 = arith.constant 0 : index
    %12 = vector.load %arg2[%c56, %c0_6] : memref<544x128xf32, #tpu.memory_space<vmem>>, vector<4x32xf32>
    %c64 = arith.constant 64 : index
    %c0_7 = arith.constant 0 : index
    %13 = vector.load %arg2[%c64, %c0_7] : memref<544x128xf32, #tpu.memory_space<vmem>>, vector<32x32xf32>
    %c128 = arith.constant 128 : index
    %c0_8 = arith.constant 0 : index
    %14 = vector.load %arg2[%c128, %c0_8] : memref<544x128xf32, #tpu.memory_space<vmem>>, vector<32x32xf32>
    %cst_9 = arith.constant dense<0.000000e+00> : vector<4x32xf32>
    %15 = tpu.matmul %12, %13, %cst_9 {dimension_numbers = #tpu.dot_dimension_numbers<[1], [0], [0], [1], [0, 0, 1, 1], [], []>} : vector<4x32xf32>, vector<32x32xf32>, vector<4x32xf32> -> vector<4x32xf32>
    %16 = tpu.concatenate %15, %15 in 0 : vector<4x32xf32>, vector<4x32xf32> -> vector<8x32xf32>
    %17 = vector.extract_strided_slice %16 {offsets = [0, 0], sizes = [4, 32], strides = [1, 1]} : vector<8x32xf32> to vector<4x32xf32>
    %cst_10 = arith.constant dense<0.000000e+00> : vector<4x16xf32>
    %18 = tpu.matmul %17, %8, %cst_10 {dimension_numbers = #tpu.dot_dimension_numbers<[1], [1], [0], [0], [0, 0, 1, 0], [], []>} : vector<4x32xf32>, vector<16x32xf32>, vector<4x16xf32> -> vector<4x16xf32>
    %cst_11 = arith.constant 0.176776692 : f32
    %19 = vector.broadcast %cst_11 : f32 to vector<4x16xf32>
    %20 = arith.mulf %18, %19 : vector<4x16xf32>
    %cst_12 = arith.constant dense<0xFF800000> : vector<16xf32>
    %21 = vector.multi_reduction <maximumf>, %20, %cst_12 [0] : vector<4x16xf32> to vector<16xf32>
    %22 = vector.shape_cast %21 : vector<16xf32> to vector<1x16xf32>
    %23 = vector.broadcast %22 : vector<1x16xf32> to vector<4x16xf32>
    %24 = arith.subf %20, %23 : vector<4x16xf32>
    %25 = math.exp %24 : vector<4x16xf32>
    %cst_13 = arith.constant dense<0.000000e+00> : vector<16xf32>
    %26 = vector.multi_reduction <add>, %25, %cst_13 [0] : vector<4x16xf32> to vector<16xf32>
    %27 = vector.shape_cast %26 : vector<16xf32> to vector<1x16xf32>
    %28 = vector.broadcast %27 : vector<1x16xf32> to vector<4x16xf32>
    %29 = arith.divf %25, %28 : vector<4x16xf32>
    %30 = vector.broadcast %22 : vector<1x16xf32> to vector<4x16xf32>
    %31 = arith.subf %20, %30 : vector<4x16xf32>
    %32 = math.log %27 : vector<1x16xf32>
    %33 = vector.broadcast %32 : vector<1x16xf32> to vector<4x16xf32>
    %34 = arith.subf %31, %33 : vector<4x16xf32>
    %cst_14 = arith.constant dense<0.000000e+00> : vector<4xf32>
    %35 = vector.multi_reduction <add>, %29, %cst_14 [1] : vector<4x16xf32> to vector<4xf32>
    %36 = vector.shape_cast %35 : vector<4xf32> to vector<4x1xf32>
    %cst_15 = arith.constant 9.99999993E-9 : f32
    %37 = vector.broadcast %cst_15 : f32 to vector<4x1xf32>
    %38 = arith.addf %36, %37 : vector<4x1xf32>
    %39 = vector.broadcast %38 : vector<4x1xf32> to vector<4x16xf32>
    %40 = arith.divf %29, %39 : vector<4x16xf32>
    %cst_16 = arith.constant dense<0.000000e+00> : vector<4x32xf32>
    %41 = tpu.matmul %40, %10, %cst_16 {dimension_numbers = #tpu.dot_dimension_numbers<[1], [0], [0], [1], [0, 0, 1, 1], [], []>} : vector<4x16xf32>, vector<16x32xf32>, vector<4x32xf32> -> vector<4x32xf32>
    %42 = vector.extract_strided_slice %16 {offsets = [4, 0], sizes = [4, 32], strides = [1, 1]} : vector<8x32xf32> to vector<4x32xf32>
    %cst_17 = arith.constant dense<0.000000e+00> : vector<4x16xf32>
    %43 = tpu.matmul %42, %9, %cst_17 {dimension_numbers = #tpu.dot_dimension_numbers<[1], [1], [0], [0], [0, 0, 1, 0], [], []>} : vector<4x32xf32>, vector<16x32xf32>, vector<4x16xf32> -> vector<4x16xf32>
    %cst_18 = arith.constant 0.176776692 : f32
    %44 = vector.broadcast %cst_18 : f32 to vector<4x16xf32>
    %45 = arith.mulf %43, %44 : vector<4x16xf32>
    %cst_19 = arith.constant dense<0xFF800000> : vector<16xf32>
    %46 = vector.multi_reduction <maximumf>, %45, %cst_19 [0] : vector<4x16xf32> to vector<16xf32>
    %47 = vector.shape_cast %46 : vector<16xf32> to vector<1x16xf32>
    %48 = vector.broadcast %47 : vector<1x16xf32> to vector<4x16xf32>
    %49 = arith.subf %45, %48 : vector<4x16xf32>
    %50 = math.exp %49 : vector<4x16xf32>
    %cst_20 = arith.constant dense<0.000000e+00> : vector<16xf32>
    %51 = vector.multi_reduction <add>, %50, %cst_20 [0] : vector<4x16xf32> to vector<16xf32>
    %52 = vector.shape_cast %51 : vector<16xf32> to vector<1x16xf32>
    %53 = vector.broadcast %52 : vector<1x16xf32> to vector<4x16xf32>
    %54 = arith.divf %50, %53 : vector<4x16xf32>
    %55 = vector.broadcast %47 : vector<1x16xf32> to vector<4x16xf32>
    %56 = arith.subf %45, %55 : vector<4x16xf32>
    %57 = math.log %52 : vector<1x16xf32>
    %58 = vector.broadcast %57 : vector<1x16xf32> to vector<4x16xf32>
    %59 = arith.subf %56, %58 : vector<4x16xf32>
    %cst_21 = arith.constant dense<0.000000e+00> : vector<4xf32>
    %60 = vector.multi_reduction <add>, %54, %cst_21 [1] : vector<4x16xf32> to vector<4xf32>
    %61 = vector.shape_cast %60 : vector<4xf32> to vector<4x1xf32>
    %cst_22 = arith.constant 9.99999993E-9 : f32
    %62 = vector.broadcast %cst_22 : f32 to vector<4x1xf32>
    %63 = arith.addf %61, %62 : vector<4x1xf32>
    %64 = vector.broadcast %63 : vector<4x1xf32> to vector<4x16xf32>
    %65 = arith.divf %54, %64 : vector<4x16xf32>
    %cst_23 = arith.constant dense<0.000000e+00> : vector<4x32xf32>
    %66 = tpu.matmul %65, %11, %cst_23 {dimension_numbers = #tpu.dot_dimension_numbers<[1], [0], [0], [1], [0, 0, 1, 1], [], []>} : vector<4x16xf32>, vector<16x32xf32>, vector<4x32xf32> -> vector<4x32xf32>
    %67 = tpu.concatenate %41, %66 in 0 : vector<4x32xf32>, vector<4x32xf32> -> vector<8x32xf32>
    %cst_24 = arith.constant dense<0.000000e+00> : vector<8x32xf32>
    %68 = tpu.matmul %67, %14, %cst_24 {dimension_numbers = #tpu.dot_dimension_numbers<[1], [0], [0], [1], [0, 0, 1, 1], [], []>} : vector<8x32xf32>, vector<32x32xf32>, vector<8x32xf32> -> vector<8x32xf32>
    %69 = tpu.concatenate %29, %54 in 0 : vector<4x16xf32>, vector<4x16xf32> -> vector<8x16xf32>
    %c160 = arith.constant 160 : index
    %c0_25 = arith.constant 0 : index
    %70 = vector.load %arg2[%c160, %c0_25] : memref<544x128xf32, #tpu.memory_space<vmem>>, vector<8x32xf32>
    %c168 = arith.constant 168 : index
    %c0_26 = arith.constant 0 : index
    %71 = vector.load %arg2[%c168, %c0_26] : memref<544x128xf32, #tpu.memory_space<vmem>>, vector<1x8xf32>
    %cst_27 = arith.constant dense<0.000000e+00> : vector<8x8xf32>
    %72 = tpu.matmul %68, %70, %cst_27 {dimension_numbers = #tpu.dot_dimension_numbers<[1], [1], [0], [0], [0, 0, 1, 0], [], []>} : vector<8x32xf32>, vector<8x32xf32>, vector<8x8xf32> -> vector<8x8xf32>
    %cst_28 = arith.constant 2.000000e+00 : f32
    %73 = vector.broadcast %cst_28 : f32 to vector<8x8xf32>
    %74 = arith.mulf %73, %72 : vector<8x8xf32>
    %75 = vector.broadcast %71 : vector<1x8xf32> to vector<8x8xf32>
    %76 = arith.subf %75, %74 : vector<8x8xf32>
    %cst_29 = arith.constant dense<0x7F800000> : vector<8xf32>
    %77 = vector.multi_reduction <minimumf>, %76, %cst_29 [1] : vector<8x8xf32> to vector<8xf32>
    %78 = vector.shape_cast %77 : vector<8xf32> to vector<8x1xf32>
    %79 = tpu.iota {dimensions = array<i32: 1>} : vector<8x8xi32>
    %80 = vector.broadcast %78 : vector<8x1xf32> to vector<8x8xf32>
    %81 = arith.cmpf ole, %76, %80 : vector<8x8xf32>
    %c8_i32 = arith.constant 8 : i32
    %82 = vector.broadcast %c8_i32 : i32 to vector<8x8xi32>
    %83 = arith.select %81, %79, %82 : vector<8x8xi1>, vector<8x8xi32>
    %cst_30 = arith.constant dense<2147483647> : vector<8xi32>
    %84 = vector.multi_reduction <minsi>, %83, %cst_30 [1] : vector<8x8xi32> to vector<8xi32>
    %85 = vector.shape_cast %84 : vector<8xi32> to vector<8x1xi32>
    %86 = vector.broadcast %85 : vector<8x1xi32> to vector<8x8xi32>
    %87 = arith.cmpi eq, %79, %86 : vector<8x8xi32>
    %88 = arith.extui %87 : vector<8x8xi1> to vector<8x8xi32>
    %89 = arith.sitofp %88 : vector<8x8xi32> to vector<8x8xf32>
    %cst_31 = arith.constant dense<0.000000e+00> : vector<8x32xf32>
    %90 = tpu.matmul %89, %70, %cst_31 {dimension_numbers = #tpu.dot_dimension_numbers<[1], [0], [0], [1], [0, 0, 1, 1], [], []>} : vector<8x8xf32>, vector<8x32xf32>, vector<8x32xf32> -> vector<8x32xf32>
    %91 = arith.subf %90, %68 : vector<8x32xf32>
    %92 = arith.mulf %91, %91 : vector<8x32xf32>
    %93 = vector.shape_cast %92 : vector<8x32xf32> to vector<1x8x32xf32>
    %cst_32 = arith.constant dense<0.000000e+00> : vector<1xf32>
    %94 = vector.multi_reduction <add>, %93, %cst_32 [1, 2] : vector<1x8x32xf32> to vector<1xf32>
    %95 = vector.shape_cast %94 : vector<1xf32> to vector<1x1x1xf32>
    %96 = vector.extract %95[0, 0, 0] : f32 from vector<1x1x1xf32>
    %97 = vector.broadcast %96 : f32 to vector<1x1xf32>
    %98 = tpu.concatenate %12, %12 in 0 : vector<4x32xf32>, vector<4x32xf32> -> vector<8x32xf32>
    %cst_33 = arith.constant 1.000000e+00 : f32
    %99 = vector.broadcast %cst_33 : f32 to vector<8x32xf32>
    %100 = arith.addf %99, %90 : vector<8x32xf32>
    %101 = arith.mulf %98, %100 : vector<8x32xf32>
    %cst_34 = arith.constant dense<0.000000e+00> : vector<8x32xf32>
    %102 = tpu.matmul %101, %13, %cst_34 {dimension_numbers = #tpu.dot_dimension_numbers<[1], [0], [0], [1], [0, 0, 1, 1], [], []>} : vector<8x32xf32>, vector<32x32xf32>, vector<8x32xf32> -> vector<8x32xf32>
    %103 = vector.extract_strided_slice %102 {offsets = [0, 0], sizes = [4, 32], strides = [1, 1]} : vector<8x32xf32> to vector<4x32xf32>
    %cst_35 = arith.constant dense<0.000000e+00> : vector<4x16xf32>
    %104 = tpu.matmul %103, %8, %cst_35 {dimension_numbers = #tpu.dot_dimension_numbers<[1], [1], [0], [0], [0, 0, 1, 0], [], []>} : vector<4x32xf32>, vector<16x32xf32>, vector<4x16xf32> -> vector<4x16xf32>
    %cst_36 = arith.constant 0.176776692 : f32
    %105 = vector.broadcast %cst_36 : f32 to vector<4x16xf32>
    %106 = arith.mulf %104, %105 : vector<4x16xf32>
    %107 = arith.addf %106, %34 : vector<4x16xf32>
    %cst_37 = arith.constant dense<0xFF800000> : vector<16xf32>
    %108 = vector.multi_reduction <maximumf>, %107, %cst_37 [0] : vector<4x16xf32> to vector<16xf32>
    %109 = vector.shape_cast %108 : vector<16xf32> to vector<1x16xf32>
    %110 = vector.broadcast %109 : vector<1x16xf32> to vector<4x16xf32>
    %111 = arith.subf %107, %110 : vector<4x16xf32>
    %112 = math.exp %111 : vector<4x16xf32>
    %cst_38 = arith.constant dense<0.000000e+00> : vector<16xf32>
    %113 = vector.multi_reduction <add>, %112, %cst_38 [0] : vector<4x16xf32> to vector<16xf32>
    %114 = vector.shape_cast %113 : vector<16xf32> to vector<1x16xf32>
    %115 = vector.broadcast %114 : vector<1x16xf32> to vector<4x16xf32>
    %116 = arith.divf %112, %115 : vector<4x16xf32>
    %cst_39 = arith.constant dense<0.000000e+00> : vector<4xf32>
    %117 = vector.multi_reduction <add>, %116, %cst_39 [1] : vector<4x16xf32> to vector<4xf32>
    %118 = vector.shape_cast %117 : vector<4xf32> to vector<4x1xf32>
    %cst_40 = arith.constant 9.99999993E-9 : f32
    %119 = vector.broadcast %cst_40 : f32 to vector<4x1xf32>
    %120 = arith.addf %118, %119 : vector<4x1xf32>
    %121 = vector.broadcast %120 : vector<4x1xf32> to vector<4x16xf32>
    %122 = arith.divf %116, %121 : vector<4x16xf32>
    %cst_41 = arith.constant dense<0.000000e+00> : vector<4x32xf32>
    %123 = tpu.matmul %122, %10, %cst_41 {dimension_numbers = #tpu.dot_dimension_numbers<[1], [0], [0], [1], [0, 0, 1, 1], [], []>} : vector<4x16xf32>, vector<16x32xf32>, vector<4x32xf32> -> vector<4x32xf32>
    %124 = vector.extract_strided_slice %102 {offsets = [4, 0], sizes = [4, 32], strides = [1, 1]} : vector<8x32xf32> to vector<4x32xf32>
    %cst_42 = arith.constant dense<0.000000e+00> : vector<4x16xf32>
    %125 = tpu.matmul %124, %9, %cst_42 {dimension_numbers = #tpu.dot_dimension_numbers<[1], [1], [0], [0], [0, 0, 1, 0], [], []>} : vector<4x32xf32>, vector<16x32xf32>, vector<4x16xf32> -> vector<4x16xf32>
    %cst_43 = arith.constant 0.176776692 : f32
    %126 = vector.broadcast %cst_43 : f32 to vector<4x16xf32>
    %127 = arith.mulf %125, %126 : vector<4x16xf32>
    %128 = arith.addf %127, %59 : vector<4x16xf32>
    %cst_44 = arith.constant dense<0xFF800000> : vector<16xf32>
    %129 = vector.multi_reduction <maximumf>, %128, %cst_44 [0] : vector<4x16xf32> to vector<16xf32>
    %130 = vector.shape_cast %129 : vector<16xf32> to vector<1x16xf32>
    %131 = vector.broadcast %130 : vector<1x16xf32> to vector<4x16xf32>
    %132 = arith.subf %128, %131 : vector<4x16xf32>
    %133 = math.exp %132 : vector<4x16xf32>
    %cst_45 = arith.constant dense<0.000000e+00> : vector<16xf32>
    %134 = vector.multi_reduction <add>, %133, %cst_45 [0] : vector<4x16xf32> to vector<16xf32>
    %135 = vector.shape_cast %134 : vector<16xf32> to vector<1x16xf32>
    %136 = vector.broadcast %135 : vector<1x16xf32> to vector<4x16xf32>
    %137 = arith.divf %133, %136 : vector<4x16xf32>
    %cst_46 = arith.constant dense<0.000000e+00> : vector<4xf32>
    %138 = vector.multi_reduction <add>, %137, %cst_46 [1] : vector<4x16xf32> to vector<4xf32>
    %139 = vector.shape_cast %138 : vector<4xf32> to vector<4x1xf32>
    %cst_47 = arith.constant 9.99999993E-9 : f32
    %140 = vector.broadcast %cst_47 : f32 to vector<4x1xf32>
    %141 = arith.addf %139, %140 : vector<4x1xf32>
    %142 = vector.broadcast %141 : vector<4x1xf32> to vector<4x16xf32>
    %143 = arith.divf %137, %142 : vector<4x16xf32>
    %cst_48 = arith.constant dense<0.000000e+00> : vector<4x32xf32>
    %144 = tpu.matmul %143, %11, %cst_48 {dimension_numbers = #tpu.dot_dimension_numbers<[1], [0], [0], [1], [0, 0, 1, 1], [], []>} : vector<4x16xf32>, vector<16x32xf32>, vector<4x32xf32> -> vector<4x32xf32>
    %145 = tpu.concatenate %123, %144 in 0 : vector<4x32xf32>, vector<4x32xf32> -> vector<8x32xf32>
    %cst_49 = arith.constant dense<0.000000e+00> : vector<8x32xf32>
    %146 = tpu.matmul %145, %14, %cst_49 {dimension_numbers = #tpu.dot_dimension_numbers<[1], [0], [0], [1], [0, 0, 1, 1], [], []>} : vector<8x32xf32>, vector<32x32xf32>, vector<8x32xf32> -> vector<8x32xf32>
    %147 = tpu.concatenate %116, %137 in 0 : vector<4x16xf32>, vector<4x16xf32> -> vector<8x16xf32>
    %c288 = arith.constant 288 : index
    %c0_50 = arith.constant 0 : index
    %148 = vector.load %arg2[%c288, %c0_50] : memref<544x128xf32, #tpu.memory_space<vmem>>, vector<128x8xf32>
    %cst_51 = arith.constant dense<0.000000e+00> : vector<128x32xf32>
    %149 = tpu.matmul %148, %146, %cst_51 {dimension_numbers = #tpu.dot_dimension_numbers<[1], [0], [0], [1], [0, 0, 1, 1], [], []>} : vector<128x8xf32>, vector<8x32xf32>, vector<128x32xf32> -> vector<128x32xf32>
    %c416 = arith.constant 416 : index
    %c0_52 = arith.constant 0 : index
    %150 = vector.load %arg2[%c416, %c0_52] : memref<544x128xf32, #tpu.memory_space<vmem>>, vector<128x32xf32>
    %151 = arith.addf %149, %150 : vector<128x32xf32>
    %c176 = arith.constant 176 : index
    %c0_53 = arith.constant 0 : index
    %152 = vector.load %arg2[%c176, %c0_53] : memref<544x128xf32, #tpu.memory_space<vmem>>, vector<32x64xf32>
    %cst_54 = arith.constant dense<0.000000e+00> : vector<128x64xf32>
    %153 = tpu.matmul %151, %152, %cst_54 {dimension_numbers = #tpu.dot_dimension_numbers<[1], [0], [0], [1], [0, 0, 1, 1], [], []>} : vector<128x32xf32>, vector<32x64xf32>, vector<128x64xf32> -> vector<128x64xf32>
    %c208 = arith.constant 208 : index
    %c0_55 = arith.constant 0 : index
    %154 = vector.load %arg2[%c208, %c0_55] : memref<544x128xf32, #tpu.memory_space<vmem>>, vector<1x64xf32>
    %155 = vector.broadcast %154 : vector<1x64xf32> to vector<128x64xf32>
    %156 = arith.addf %153, %155 : vector<128x64xf32>
    %cst_56 = arith.constant 0.000000e+00 : f32
    %157 = vector.broadcast %cst_56 : f32 to vector<128x64xf32>
    %158 = arith.maximumf %156, %157 : vector<128x64xf32>
    %c216 = arith.constant 216 : index
    %c0_57 = arith.constant 0 : index
    %159 = vector.load %arg2[%c216, %c0_57] : memref<544x128xf32, #tpu.memory_space<vmem>>, vector<64x33xf32>
    %cst_58 = arith.constant dense<0.000000e+00> : vector<128x33xf32>
    %160 = tpu.matmul %158, %159, %cst_58 {dimension_numbers = #tpu.dot_dimension_numbers<[1], [0], [0], [1], [0, 0, 1, 1], [], []>} : vector<128x64xf32>, vector<64x33xf32>, vector<128x33xf32> -> vector<128x33xf32>
    %c280 = arith.constant 280 : index
    %c0_59 = arith.constant 0 : index
    %161 = vector.load %arg2[%c280, %c0_59] : memref<544x128xf32, #tpu.memory_space<vmem>>, vector<1x33xf32>
    %162 = vector.broadcast %161 : vector<1x33xf32> to vector<128x33xf32>
    %163 = arith.addf %160, %162 : vector<128x33xf32>
    %164 = vector.extract_strided_slice %163 {offsets = [0, 0], sizes = [128, 32], strides = [1, 1]} : vector<128x33xf32> to vector<128x32xf32>
    %165 = vector.extract_strided_slice %163 {offsets = [0, 32], sizes = [128, 1], strides = [1, 1]} : vector<128x33xf32> to vector<128x1xf32>
    %166 = vector.extract_strided_slice %165 {offsets = [0, 0], sizes = [16, 1], strides = [1, 1]} : vector<128x1xf32> to vector<16x1xf32>
    %167 = vector.extract_strided_slice %165 {offsets = [16, 0], sizes = [16, 1], strides = [1, 1]} : vector<128x1xf32> to vector<16x1xf32>
    %168 = vector.extract_strided_slice %165 {offsets = [32, 0], sizes = [16, 1], strides = [1, 1]} : vector<128x1xf32> to vector<16x1xf32>
    %169 = vector.extract_strided_slice %165 {offsets = [48, 0], sizes = [16, 1], strides = [1, 1]} : vector<128x1xf32> to vector<16x1xf32>
    %170 = tpu.concatenate %166, %167, %168, %169 in 1 : vector<16x1xf32>, vector<16x1xf32>, vector<16x1xf32>, vector<16x1xf32> -> vector<16x4xf32>
    %cst_60 = arith.constant dense<0xFF800000> : vector<16xf32>
    %171 = vector.multi_reduction <maximumf>, %170, %cst_60 [1] : vector<16x4xf32> to vector<16xf32>
    %172 = vector.shape_cast %171 : vector<16xf32> to vector<16x1xf32>
    %173 = vector.broadcast %172 : vector<16x1xf32> to vector<16x4xf32>
    %174 = arith.subf %170, %173 : vector<16x4xf32>
    %175 = math.exp %174 : vector<16x4xf32>
    %cst_61 = arith.constant dense<0.000000e+00> : vector<16xf32>
    %176 = vector.multi_reduction <add>, %175, %cst_61 [1] : vector<16x4xf32> to vector<16xf32>
    %177 = vector.shape_cast %176 : vector<16xf32> to vector<16x1xf32>
    %178 = vector.broadcast %177 : vector<16x1xf32> to vector<16x4xf32>
    %179 = arith.divf %175, %178 : vector<16x4xf32>
    %180 = vector.extract_strided_slice %164 {offsets = [0, 0], sizes = [16, 32], strides = [1, 1]} : vector<128x32xf32> to vector<16x32xf32>
    %181 = vector.extract_strided_slice %179 {offsets = [0, 0], sizes = [16, 1], strides = [1, 1]} : vector<16x4xf32> to vector<16x1xf32>
    %182 = vector.broadcast %181 : vector<16x1xf32> to vector<16x32xf32>
    %183 = arith.mulf %182, %180 : vector<16x32xf32>
    %184 = vector.extract_strided_slice %164 {offsets = [16, 0], sizes = [16, 32], strides = [1, 1]} : vector<128x32xf32> to vector<16x32xf32>
    %185 = vector.extract_strided_slice %179 {offsets = [0, 1], sizes = [16, 1], strides = [1, 1]} : vector<16x4xf32> to vector<16x1xf32>
    %186 = vector.broadcast %185 : vector<16x1xf32> to vector<16x32xf32>
    %187 = arith.mulf %186, %184 : vector<16x32xf32>
    %188 = arith.addf %183, %187 : vector<16x32xf32>
    %189 = vector.extract_strided_slice %164 {offsets = [32, 0], sizes = [16, 32], strides = [1, 1]} : vector<128x32xf32> to vector<16x32xf32>
    %190 = vector.extract_strided_slice %179 {offsets = [0, 2], sizes = [16, 1], strides = [1, 1]} : vector<16x4xf32> to vector<16x1xf32>
    %191 = vector.broadcast %190 : vector<16x1xf32> to vector<16x32xf32>
    %192 = arith.mulf %191, %189 : vector<16x32xf32>
    %193 = arith.addf %188, %192 : vector<16x32xf32>
    %194 = vector.extract_strided_slice %164 {offsets = [48, 0], sizes = [16, 32], strides = [1, 1]} : vector<128x32xf32> to vector<16x32xf32>
    %195 = vector.extract_strided_slice %179 {offsets = [0, 3], sizes = [16, 1], strides = [1, 1]} : vector<16x4xf32> to vector<16x1xf32>
    %196 = vector.broadcast %195 : vector<16x1xf32> to vector<16x32xf32>
    %197 = arith.mulf %196, %194 : vector<16x32xf32>
    %198 = arith.addf %193, %197 : vector<16x32xf32>
    %199 = tpu.transpose %179, [1, 0] : vector<16x4xf32> -> vector<4x16xf32>
    %200 = vector.extract_strided_slice %165 {offsets = [64, 0], sizes = [16, 1], strides = [1, 1]} : vector<128x1xf32> to vector<16x1xf32>
    %201 = vector.extract_strided_slice %165 {offsets = [80, 0], sizes = [16, 1], strides = [1, 1]} : vector<128x1xf32> to vector<16x1xf32>
    %202 = vector.extract_strided_slice %165 {offsets = [96, 0], sizes = [16, 1], strides = [1, 1]} : vector<128x1xf32> to vector<16x1xf32>
    %203 = vector.extract_strided_slice %165 {offsets = [112, 0], sizes = [16, 1], strides = [1, 1]} : vector<128x1xf32> to vector<16x1xf32>
    %204 = tpu.concatenate %200, %201, %202, %203 in 1 : vector<16x1xf32>, vector<16x1xf32>, vector<16x1xf32>, vector<16x1xf32> -> vector<16x4xf32>
    %cst_62 = arith.constant dense<0xFF800000> : vector<16xf32>
    %205 = vector.multi_reduction <maximumf>, %204, %cst_62 [1] : vector<16x4xf32> to vector<16xf32>
    %206 = vector.shape_cast %205 : vector<16xf32> to vector<16x1xf32>
    %207 = vector.broadcast %206 : vector<16x1xf32> to vector<16x4xf32>
    %208 = arith.subf %204, %207 : vector<16x4xf32>
    %209 = math.exp %208 : vector<16x4xf32>
    %cst_63 = arith.constant dense<0.000000e+00> : vector<16xf32>
    %210 = vector.multi_reduction <add>, %209, %cst_63 [1] : vector<16x4xf32> to vector<16xf32>
    %211 = vector.shape_cast %210 : vector<16xf32> to vector<16x1xf32>
    %212 = vector.broadcast %211 : vector<16x1xf32> to vector<16x4xf32>
    %213 = arith.divf %209, %212 : vector<16x4xf32>
    %214 = vector.extract_strided_slice %164 {offsets = [64, 0], sizes = [16, 32], strides = [1, 1]} : vector<128x32xf32> to vector<16x32xf32>
    %215 = vector.extract_strided_slice %213 {offsets = [0, 0], sizes = [16, 1], strides = [1, 1]} : vector<16x4xf32> to vector<16x1xf32>
    %216 = vector.broadcast %215 : vector<16x1xf32> to vector<16x32xf32>
    %217 = arith.mulf %216, %214 : vector<16x32xf32>
    %218 = vector.extract_strided_slice %164 {offsets = [80, 0], sizes = [16, 32], strides = [1, 1]} : vector<128x32xf32> to vector<16x32xf32>
    %219 = vector.extract_strided_slice %213 {offsets = [0, 1], sizes = [16, 1], strides = [1, 1]} : vector<16x4xf32> to vector<16x1xf32>
    %220 = vector.broadcast %219 : vector<16x1xf32> to vector<16x32xf32>
    %221 = arith.mulf %220, %218 : vector<16x32xf32>
    %222 = arith.addf %217, %221 : vector<16x32xf32>
    %223 = vector.extract_strided_slice %164 {offsets = [96, 0], sizes = [16, 32], strides = [1, 1]} : vector<128x32xf32> to vector<16x32xf32>
    %224 = vector.extract_strided_slice %213 {offsets = [0, 2], sizes = [16, 1], strides = [1, 1]} : vector<16x4xf32> to vector<16x1xf32>
    %225 = vector.broadcast %224 : vector<16x1xf32> to vector<16x32xf32>
    %226 = arith.mulf %225, %223 : vector<16x32xf32>
    %227 = arith.addf %222, %226 : vector<16x32xf32>
    %228 = vector.extract_strided_slice %164 {offsets = [112, 0], sizes = [16, 32], strides = [1, 1]} : vector<128x32xf32> to vector<16x32xf32>
    %229 = vector.extract_strided_slice %213 {offsets = [0, 3], sizes = [16, 1], strides = [1, 1]} : vector<16x4xf32> to vector<16x1xf32>
    %230 = vector.broadcast %229 : vector<16x1xf32> to vector<16x32xf32>
    %231 = arith.mulf %230, %228 : vector<16x32xf32>
    %232 = arith.addf %227, %231 : vector<16x32xf32>
    %233 = tpu.transpose %213, [1, 0] : vector<16x4xf32> -> vector<4x16xf32>
    %234 = tpu.concatenate %198, %232 in 0 : vector<16x32xf32>, vector<16x32xf32> -> vector<32x32xf32>
    %235 = tpu.concatenate %199, %233 in 0 : vector<4x16xf32>, vector<4x16xf32> -> vector<8x16xf32>
    %cst_64 = arith.constant 0.000000e+00 : f32
    %236 = vector.broadcast %cst_64 : f32 to vector<32x64xf32>
    %237 = tpu.concatenate %5, %234, %236 in 1 : vector<32x32xf32>, vector<32x32xf32>, vector<32x64xf32> -> vector<32x128xf32>
    %c0_65 = arith.constant 0 : index
    %c0_66 = arith.constant 0 : index
    %238 = vector.load %arg3[%c0_65, %c0_66] : memref<32x128xf32, #tpu.memory_space<vmem>>, vector<32x128xf32>
    tpu.vector_store %arg3[%c0_65, %c0_66], %237 {strides = array<i32>} : memref<32x128xf32, #tpu.memory_space<vmem>>, vector<32x128xf32>,
    %cst_67 = arith.constant 0.000000e+00 : f32
    %239 = vector.broadcast %cst_67 : f32 to vector<8x110xf32>
    %240 = arith.sitofp %85 : vector<8x1xi32> to vector<8x1xf32>
    %241 = vector.shape_cast %97 : vector<1x1xf32> to vector<1x1xf32>
    %242 = vector.broadcast %241 : vector<1x1xf32> to vector<8x1xf32>
    %243 = tpu.concatenate %68, %146, %90, %69, %147, %235, %240, %242, %239 in 1 : vector<8x32xf32>, vector<8x32xf32>, vector<8x32xf32>, vector<8x16xf32>, vector<8x16xf32>, vector<8x16xf32>, vector<8x1xf32>, vector<8x1xf32>, vector<8x110xf32> -> vector<8x256xf32>
    %c0_68 = arith.constant 0 : index
    %c0_69 = arith.constant 0 : index
    %244 = vector.load %arg4[%c0_68, %c0_69] : memref<8x256xf32, #tpu.memory_space<vmem>>, vector<8x256xf32>
    tpu.vector_store %arg4[%c0_68, %c0_69], %243 {strides = array<i32>} : memref<8x256xf32, #tpu.memory_space<vmem>>, vector<8x256xf32>,
    return
  }
  func.func @transform_0(%arg0: i32) -> (i32, i32) {
    %c0_i32 = arith.constant 0 : i32
    %c0_i32_0 = arith.constant 0 : i32
    %c0_i32_1 = arith.constant 0 : i32
    return %c0_i32, %c0_i32_0 : i32, i32
  }
  func.func @transform_1(%arg0: i32) -> (i32, i32) {
    %c0_i32 = arith.constant 0 : i32
    %c0_i32_0 = arith.constant 0 : i32
    %c0_i32_1 = arith.constant 0 : i32
    return %c0_i32, %c0_i32_0 : i32, i32
  }
  func.func @transform_2(%arg0: i32) -> (i32, i32) {
    %c0_i32 = arith.constant 0 : i32
    %c0_i32_0 = arith.constant 0 : i32
    %c0_i32_1 = arith.constant 0 : i32
    return %c0_i32, %c0_i32_0 : i32, i32
  }
  func.func @transform_3(%arg0: i32) -> (i32, i32) {
    %c0_i32 = arith.constant 0 : i32
    %c0_i32_0 = arith.constant 0 : i32
    %c0_i32_1 = arith.constant 0 : i32
    return %c0_i32, %c0_i32_0 : i32, i32
  }
}

</mosaic_0001>

<bundles_post_ra>
// kernel: forward.1
= control target key start
LH: loop header
LB: loop body
LE: loop exit
PB: predicated region body
PF: predicated region fallthrough
CT: control target
= control target key end

     0   :  { %vm28_vm0 = vcmask 392192   ;;  %v3108_v19 = vmov 0.0|0.0   ;;  %vm3109_vm1 = vmmov 0   ;;  %v3110_v20 = vmov 0.0   ;;  %s3111_s24 = smov 96   ;;  %s3112_s20 = smov 97   ;;  %s3761_s1 = inlined_call_operand.vmem [shape: f32[544,128], index: 1, kind: input, shape index: {}]   ;;  %s3762_s0 = inlined_call_operand.vmem [shape: f32[32,48], index: 0, kind: input, shape index: {}]   ;;  %s3763_s3 = inlined_call_operand.vmem [shape: f32[8,256], index: 3, kind: output, shape index: {1}]   ;;  %s3764_s2 = inlined_call_operand.vmem [shape: f32[32,128], index: 2, kind: output, shape index: {0}]  }
   0x1   :  { %v17_v0 = vld [vmem:[%s3761_s1] sm:$0xff]  ;;  %v18_v1 = vld [vmem:[%s3761_s1 + $0x8] sm:$0xff]  ;;  %v19_v2 = vld [vmem:[%s3761_s1 + $0x10] sm:$0xff]  ;;  %2954 = vmatprep.subr.bf16.mxu0 %v3108_v19  ;;  %2735 = vmatprep.mubr.msk.f32.mxu0 %vm3109_vm1, %v3110_v20  ;;  %vm130_vm2 = vcmask 261120   ;;  %vm313_vm4 = vcmask 1043456   ;;  %vm395_vm5 = vcmask 125952  }
   0x2   :  { %v2928_v3 = vpack.c.bf16 %v18_v1, %v17_v0  ;;  %v20_v4 = vld [vmem:[%s3761_s1 + $0x18] sm:$0xff]  ;;  %v21_v6 = vld [vmem:[%s3761_s1 + $0x20] sm:$0xff]  ;;  %v22_v7 = vld [vmem:[%s3761_s1 + $0x28] sm:$0xff]  ;;  %vm430_vm6 = vcmask 130048   ;;  %vm856_vm7 = vcmask 64512   ;;  %vm1928_vm11 = vcmask 523264  }
   0x3   :  { %v2932_v5 = vpack.c.bf16 %v20_v4, %v19_v2  ;;  %v13_v8 = vld [vmem:[%s3762_s0] sm:$0xff]  ;;  %v2936_v9 = vpack.c.bf16 %v22_v7, %v21_v6  ;;  %v127_v11 = vld [vmem:[%s3761_s1 + $0x68] sm:$0xff]  ;;  %v15_v14 = vld [vmem:[%s3762_s0 + $0x10] sm:$0xff]  ;;  %s3114_s21 = smov 99   ;;  %vm2154_vm12 = vcmask 7168   ;;  %vm2157_vm13 = vcmask 15360  }
   0x4   :  { %2929 = vmatprep.subr.bf16.mxu1 %v2928_v3  ;;  %2700 = vmatprep.mubr.msk.f32.mxu1 %vm28_vm0, %v13_v8  ;;  %v126_v10 = vld [vmem:[%s3761_s1 + $0x60] sm:$0xff]  ;;  %v14_v13 = vld [vmem:[%s3762_s0 + $0x8] sm:$0xff]  ;;  %v16_v15 = vld [vmem:[%s3762_s0 + $0x18] sm:$0xff]  ;;  %vm2160_vm14 = vcmask 23552   ;;  %vm2163_vm15 = vcmask 31744   ;;  %s3119_s22 = smov 32  }
   0x5   :  { %2931 = vmatpush3.bf16.msra.mxu1 %v2928_v3  ;;  %v2940_v12 = vpack.c.bf16 %v127_v11, %v126_v10  ;;  %v128_v16 = vld [vmem:[%s3761_s1 + $0x70] sm:$0xff]  ;;  %v129_v17 = vld [vmem:[%s3761_s1 + $0x78] sm:$0xff]  ;;  %v229_v22 = vld [vmem:[%s3761_s1 + $0x40] sm:$0xff]  ;;  %s3120_s23 = smov 64   ;;  %s3121_s27 = smov 112  }
   0x6   :  { %2933 = vmatprep.subr.bf16.mxu1 %v2932_v5  ;;  %v2944_v18 = vpack.c.bf16 %v129_v17, %v128_v16  ;;  %v2477_v21 = vld [vmem:[%s3761_s1 + $0x30] ss:$0 sm:$0xff]  ;;  %v230_v23 = vld [vmem:[%s3761_s1 + $0x48] sm:$0xff]  ;;  %v232_v30 = vld [vmem:[%s3761_s1 + $0x58] sm:$0xff] }
   0x7   :  { %v3203_v27 = vpack.c.bf16 %v230_v23, %v229_v22  ;;  %v231_v29 = vld [vmem:[%s3761_s1 + $0x50] sm:$0xff]  ;;  %v3235_v36 = vld [vmem:[%s3761_s1 + $0x38] sm:$0xf]  ;;  %vm3244_vm3 = vmpackc.low %vm130_vm2, %vm130_vm2 }
   0x8   :  { %v3220_v34 = vpack.c.bf16 %v232_v30, %v231_v29 }
   0x9   :  { %2935 = vmatpush3.bf16.msra.mxu1 %v2932_v5 }
   0xa   :  { %2937 = vmatprep.subr.bf16.mxu1 %v2936_v9 }
   0xd   :  { %2939 = vmatpush3.bf16.msra.mxu1 %v2936_v9 }
   0xe   :  { %2941 = vmatprep.subr.bf16.mxu1 %v2940_v12 }
  0x10   :  { %2701 = vmatmul.mubr.msk.f32.vlgmr.msra.gmra.mrb[0].mxu1 %vm28_vm0, %v14_v13 }
  0x11   :  { %2703 = vmatprep.mubr.msk.f32.mxu1 %vm28_vm0, %v15_v14  ;;  %2943 = vmatpush3.bf16.msra.mxu1 %v2940_v12 }
  0x12   :  { %2945 = vmatprep.subr.bf16.mxu1 %v2944_v18 }
  0x14   :  { %2704 = vmatmul.mubr.msk.f32.gmra.mrb[2].mxu1 %vm28_vm0, %v16_v15  ;;  %vm2463_vm0 = vcmask 138240  }
  0x15   :  { %2947 = vmatpush3.bf16.msra.mxu1 %v2944_v18 }
  0x16   :  { %2948 = vmatprep.subr.bf16.mxu1 %v3108_v19 }
  0xe3   :  { %v2702_v24 = vpop.f32.mrb[0].mxu1 }
  0xe4   :  { %v107_v25 = vpop.f32.mrb[1].mxu1  ;;  %v3205_v28 = vadd.f32 %v2702_v24, %v2477_v21 }
  0xe5   :  { %v3201_v26 = vadd.f32 %v2477_v21, %v107_v25 }
  0xe7   :  { %v2705_v31 = vpop.f32.mrb[2].mxu1  ;;  %2714 = vmatprep.mubr.msk.f32.mxu1 %vm130_vm2, %v3201_v26 }
  0xe8   :  { %v117_v32 = vpop.f32.mrb[3].mxu1  ;;  %2715 = vmatmul.mubr.msk.f32.vlgmr.msra.gmra.mrb[4].mxu1 %vm130_vm2, %v3205_v28  ;;  %v3222_v35 = vadd.f32 %v2705_v31, %v2477_v21 }
  0xe9   :  { %v3217_v33 = vadd.f32 %v2477_v21, %v117_v32  ;;  %2950 = vmatpush3.bf16.msra.mxu1 %v3203_v27 }
  0xea   :  { %2951 = vmatprep.subr.bf16.mxu1 %v3108_v19 }
  0xeb   :  { %2717 = vmatprep.mubr.msk.f32.mxu1 %vm130_vm2, %v3217_v33 }
  0xec   :  { %2718 = vmatmul.mubr.msk.f32.gmra.mrb[6].mxu1 %vm130_vm2, %v3222_v35 }
  0xed   :  { %2953 = vmatpush3.bf16.msra.mxu1 %v3220_v34  ;;  %2728 = vmatprep.mubr.msk.f32.mxu1 %vm3109_vm1, %v3110_v20 }
  0xee   :  { %2958 = vmatprep.subr.bf16.mxu1 %v3108_v19 }
  0xf0   :  { %2729 = vmatmul.mubr.msk.f32.vlgmr.msra.gmra.mrb[8].mxu1 %vm130_vm2, %v3235_v36 }
  0xf1   :  { %2742 = vmatprep.mubr.msk.f32.mxu1 %vm3109_vm1, %v3110_v20 }
 0x1bb   :  { %v2716_v37 = vpop.f32.mrb[4].mxu1 }
 0x1bc   :  { %v209_v38 = vpop.f32.mrb[5].mxu1 }
 0x1bd   :  { %v3248_v40 = vpack.c.bf16 %v2716_v37, %v209_v38  ;;  %v3040_v41 = vpack.i.bf16 %v2716_v37, %v209_v38 }
 0x1bf   :  { %3041 = vrot.lane.b32.xlu1 %v3040_v41, %s3111_s24  ;;  %v2719_v42 = vpop.f32.mrb[6].mxu1  ;;  %2957 = vmatpush3.bf16.xpose.msk.msra.mxu0 %vm3244_vm3, %v3248_v40 }
 0x1c0   :  { %v219_v43 = vpop.f32.mrb[7].mxu1  ;;  %2961 = vmatprep.subr.bf16.mxu0 %v3108_v19 }
 0x1c1   :  { %v3045_v44 = vpack.i.bf16 %v2719_v42, %v219_v43  ;;  %v3255_v45 = vpack.c.bf16 %v2719_v42, %v219_v43 }
 0x1c3   :  { %3046 = vrot.lane.b32.xlu1 %v3045_v44, %s3111_s24  ;;  %v306_v46 = vpop.f32.mrb[8].mxu1 }
 0x1c4   :  { %v311_v47 = vrot.slane %v306_v46, 4  ;;  %v2730_v48 = vpop.f32.mrb[9].mxu1 }
 0x1c6   :  { %v314_v49 = vsel %vm313_vm4, %v306_v46, %v311_v47 }
 0x1c7   :  { %2736 = vmatmul.mubr.msk.f32.vlgmr.msra.gmra.mrb[0].mxu0 %vm130_vm2, %v314_v49  ;;  %v504_v50 = vrot.slane %v314_v49, 4 }
 0x1c8   :  { %2964 = vmatpush3.bf16.xpose.msk.msra.mxu0 %vm3244_vm3, %v3255_v45  ;;  %2749 = vmatprep.mubr.msk.f32.mxu0 %vm3109_vm1, %v3110_v20 }
 0x1c9   :  { %2770 = vmatprep.subr.mxu0 %v3110_v20 }
 0x1cf   :  { %2750 = vmatmul.mubr.msk.f32.vlgmr.msra.gmra.mrb[2].mxu0 %vm130_vm2, %v504_v50 }
 0x1d0   :  { %2772 = vmatprep.mubr.msk.f32.mxu0 %vm3109_vm1, %v3110_v20 }
 0x231   :  { %v3042_v51 = vpop.permute.xlu1 %3041 }
 0x232   :  { %v3044_v52 = vunpack.i.h.bf16 %v3042_v51  ;;  %v3043_v53 = vunpack.i.l.bf16 %v3042_v51 }
 0x234   :  { %v3269_v54 = vpack.c.bf16 %v3044_v52, %v3043_v53 }
 0x236   :  { %2960 = vmatpush3.bf16.msra.mxu1 %v3269_v54 }
 0x237   :  { %2965 = vmatprep.subr.bf16.mxu1 %v3108_v19 }
 0x29a   :  { %v390_v55 = vpop.f32.mrb[0].mxu0 }
 0x29b   :  { %v394_v56 = vmul.f32 0.17677669, %v390_v55  ;;  %v2737_v57 = vpop.f32.mrb[1].mxu0 }
 0x29d   :  { %v396_v58 = vsel %vm395_vm5, %v394_v56, -inf }
 0x29e   :  { %v397_v59 = vrot.slane %v396_v58, 4 }
 0x2a0   :  { %v398_v60 = vmax.f32 %v396_v58, %v397_v59  ;;  %v3047_v58 = vpop.permute.xlu1 %3046 }
 0x2a2   :  { %v399_v61 = vrot.slane %v398_v60, 2  ;;  %v579_v62 = vpop.f32.mrb[2].mxu0 }
 0x2a3   :  { %v583_v63 = vmul.f32 0.17677669, %v579_v62  ;;  %v2751_v0 = vpop.f32.mrb[3].mxu0  ;;  %v3048_v62 = vunpack.i.l.bf16 %v3047_v58 }
 0x2a4   :  { %v400_v1 = vmax.f32 %v398_v60, %v399_v61  ;;  %v3049_v61 = vunpack.i.h.bf16 %v3047_v58 }
 0x2a5   :  { %v584_v2 = vsel %vm395_vm5, %v583_v63, -inf }
 0x2a6   :  { %v401_v3 = vrot.slane %v400_v1, 1  ;;  %v585_v4 = vrot.slane %v584_v2, 4 }
 0x2a8   :  { %v402_v5 = vmax.f32 %v400_v1, %v401_v3  ;;  %v586_v6 = vmax.f32 %v584_v2, %v585_v4  ;;  %v3300_v1 = vpack.c.bf16 %v3049_v61, %v3048_v62  ;;  %v233_v4 = vld [vmem:[%s3761_s1 + $0x80] sm:$0xff]  ;;  %v967_v61 = vrot.slane %v3235_v36, 4 }
 0x2aa   :  { %v3275_v7 = vsub.f32 %v394_v56, %v402_v5  ;;  %v587_v8 = vrot.slane %v586_v6, 2  ;;  %v234_v5 = vld [vmem:[%s3761_s1 + $0x88] sm:$0xff] }
 0x2ac   :  { %v404_v9 = vmul.f32 1.442695, %v3275_v7  ;;  %v588_v10 = vmax.f32 %v586_v6, %v587_v8  ;;  %v3317_v6 = vpack.c.bf16 %v234_v5, %v233_v4  ;;  %v235_v8 = vld [vmem:[%s3761_s1 + $0x90] sm:$0xff] }
 0x2ae   :  { %3064 = vpow2.f32 %v404_v9  ;;  %v589_v11 = vrot.slane %v588_v10, 1  ;;  %v236_v9 = vld [vmem:[%s3761_s1 + $0x98] sm:$0xff] }
 0x2b0   :  { %v590_v12 = vmax.f32 %v588_v10, %v589_v11  ;;  %v3327_v10 = vpack.c.bf16 %v236_v9, %v235_v8  ;;  %v772_v11 = vld [vmem:[%s3761_s1 + $0xa0] sm:$0xff] }
 0x2b1   :  { %2771 = vmatpush3.xpose.msk.msra.mxu0 %vm130_vm2, %v772_v11 }
 0x2b2   :  { %v3278_v13 = vsub.f32 %v583_v63, %v590_v12  ;;  %2775 = vmatprep.subr.mxu0 %v3110_v20 }
 0x2b4   :  { %v592_v14 = vmul.f32 1.442695, %v3278_v13 }
 0x2b6   :  { %3066 = vpow2.f32 %v592_v14 }
 0x2b8   :  { %v3065_v15 = vpop.eup %3064 }
 0x2b9   :  { %v406_v16 = vsel %vm395_vm5, %v3065_v15, 0.0 }
 0x2ba   :  { %v407_v17 = vrot.slane %v406_v16, 4 }
 0x2bc   :  { %v408_v18 = vadd.f32 %v407_v17, %v406_v16 }
 0x2be   :  { %v409_v21 = vrot.slane %v408_v18, 2 }
 0x2c0   :  { %v3067_v22 = vpop.eup %3066  ;;  %v410_v23 = vadd.f32 %v409_v21, %v408_v18 }
 0x2c1   :  { %v594_v24 = vsel %vm395_vm5, %v3067_v22, 0.0 }
 0x2c2   :  { %v595_v25 = vrot.slane %v594_v24, 4  ;;  %v411_v29 = vrot.slane %v410_v23, 1 }
 0x2c4   :  { %v596_v30 = vadd.f32 %v595_v25, %v594_v24  ;;  %v412_v31 = vadd.f32 %v411_v29, %v410_v23  ;;  %v2498_v23 = vld [vmem:[%s3761_s1 + $0xa8] ss:$0 sm:$0xff] }
 0x2c6   :  { %v597_v32 = vrot.slane %v596_v30, 2  ;;  %3068 = vrcp.f32 %v412_v31 }
 0x2c7   :  { %3070 = vlog2.f32 %v412_v31 }
 0x2c8   :  { %v598_v37 = vadd.f32 %v597_v32, %v596_v30  ;;  %v860_v30 = vlaneseq }
 0x2ca   :  { %v599_v38 = vrot.slane %v598_v37, 1  ;;  %v861_v31 = vand.u32 127, %v860_v30 }
 0x2cc   :  { %v600_v41 = vadd.f32 %v599_v38, %v598_v37 }
 0x2ce   :  { %3072 = vrcp.f32 %v600_v41 }
 0x2cf   :  { %3074 = vlog2.f32 %v600_v41 }
 0x2d0   :  { %v3069_v42 = vpop.eup %3068 }
 0x2d1   :  { %v3071_v43 = vpop.eup %3070  ;;  %v3283_v44 = vmul.f32 %v3069_v42, %v3065_v15 }
 0x2d2   :  { %v3285_v46 = vmul.f32 0.6931472, %v3071_v43 }
 0x2d3   :  { %v418_v47 = vsel %vm395_vm5, %v3283_v44, 0.0 }
 0x2d4   :  { %419 = vadd.xlane.f32.xlu0 %v418_v47  ;;  %v417_v48 = vsub.f32 %v3275_v7, %v3285_v46 }
 0x2d8   :  { %v3073_v49 = vpop.eup %3072 }
 0x2d9   :  { %v3075_v50 = vpop.eup %3074  ;;  %v3291_v51 = vmul.f32 %v3073_v49, %v3067_v22 }
 0x2da   :  { %v3293_v52 = vmul.f32 0.6931472, %v3075_v50 }
 0x2db   :  { %v606_v53 = vsel %vm395_vm5, %v3291_v51, 0.0 }
 0x2dc   :  { %607 = vadd.xlane.f32.xlu0 %v606_v53  ;;  %v605_v55 = vsub.f32 %v3278_v13, %v3293_v52 }
 0x361   :  { %v420_v56 = vpop.xlane.xlu0 %419 }
 0x362   :  { %v421_v57 = vadd.f32 1e-08, %v420_v56 }
 0x364   :  { %3076 = vrcp.f32 %v421_v57 }
 0x369   :  { %v608_v59 = vpop.xlane.xlu0 %607 }
 0x36a   :  { %v609_v60 = vadd.f32 1e-08, %v608_v59 }
 0x36c   :  { %3078 = vrcp.f32 %v609_v60 }
 0x36e   :  { %v3077_v63 = vpop.eup %3076 }
 0x36f   :  { %v423_v0 = vmul.f32 %v3077_v63, %v3283_v44  ;;  %v969_v63 = vsel %vm313_vm4, %v3235_v36, %v967_v61 }
 0x371   :  { %2743 = vmatmul.mubr.msk.f32.vlgmr.msra.gmra.mrb[10].mxu1 %vm430_vm6, %v423_v0 }
 0x372   :  { %2967 = vmatpush3.bf16.msra.mxu1 %v3300_v1  ;;  %2756 = vmatprep.mubr.msk.f32.mxu1 %vm3109_vm1, %v3110_v20 }
 0x373   :  { %2968 = vmatprep.subr.bf16.mxu1 %v3108_v19 }
 0x376   :  { %v3079_v2 = vpop.eup %3078 }
 0x377   :  { %v611_v3 = vmul.f32 %v3079_v2, %v3291_v51 }
 0x379   :  { %2757 = vmatmul.mubr.msk.f32.vlgmr.msra.gmra.mrb[12].mxu1 %vm430_vm6, %v611_v3 }
 0x37a   :  { %2767 = vmatprep.mubr.msk.f32.mxu1 %vm3109_vm1, %v3110_v20  ;;  %2970 = vmatpush3.bf16.msra.mxu1 %v3317_v6 }
 0x37b   :  { %2971 = vmatprep.subr.bf16.mxu1 %v3108_v19 }
 0x37e   :  { %2973 = vmatpush3.bf16.msra.mxu1 %v3327_v10 }
 0x37f   :  { %2974 = vmatprep.subr.bf16.mxu1 %v3108_v19 }
 0x444   :  { %v500_v12 = vpop.f32.mrb[10].mxu1 }
 0x445   :  { %v2744_v14 = vpop.f32.mrb[11].mxu1 }
 0x44c   :  { %v687_v15 = vpop.f32.mrb[12].mxu1 }
 0x44d   :  { %v692_v16 = vrot.slane %v687_v15, 4  ;;  %v2758_v17 = vpop.f32.mrb[13].mxu1 }
 0x44f   :  { %v694_v18 = vsel %vm313_vm4, %v500_v12, %v692_v16 }
 0x450   :  { %2768 = vmatmul.mubr.msk.f32.vlgmr.msra.gmra.mrb[14].mxu1 %vm130_vm2, %v694_v18 }
 0x451   :  { %2976 = vmatpush3.bf16.msra.mxu1 %v3203_v27  ;;  %2788 = vmatprep.mubr.msk.f32.mxu1 %vm3109_vm1, %v3110_v20 }
 0x452   :  { %2977 = vmatprep.subr.bf16.mxu1 %v3108_v19 }
 0x455   :  { %2979 = vmatpush3.bf16.msra.mxu1 %v3220_v34 }
 0x456   :  { %2984 = vmatprep.subr.bf16.mxu1 %v3108_v19 }
 0x523   :  { %v3344_v21 = vpop.f32.mrb[14].mxu1 }
 0x524   :  { %v2769_v22 = vpop.f32.mrb[15].mxu1  ;;  %2773 = vmatmul.mubr.msk.f32.vlgmr.msra.gmra.mrb[4].mxu0 %vm130_vm2, %v3344_v21 }
 0x525   :  { %2776 = vmatpush3.msra.mxu0 %v772_v11  ;;  %2777 = vmatprep.mubr.msk.f32.mxu0 %vm3109_vm1, %v3110_v20 }
 0x526   :  { %2980 = vmatprep.subr.bf16.mxu0 %v3108_v19 }
 0x5f7   :  { %v846_v27 = vpop.f32.mrb[4].mxu0 }
 0x5f8   :  { %v850_v34 = vmul.f32 2.0, %v846_v27  ;;  %v2774_v24 = vpop.f32.mrb[5].mxu0 }
 0x5fa   :  { %v855_v25 = vsub.f32 %v2498_v23, %v850_v34 }
 0x5fc   :  { %v857_v29 = vsel %vm856_vm7, %v855_v25, inf }
 0x5fd   :  { %858 = vmin.xlane.f32.xlu0 %v857_v29 }
 0x68a   :  { %v859_v32 = vpop.xlane.xlu0 %858 }
 0x68b   :  { %vm862_vm8 = vcmp.le.f32.partialorder %v855_v25, %v859_v32 }
 0x68c   :  { %v863_v37 = vsel %vm862_vm8, %v861_v31, 8 }
 0x68d   :  { %v864_v38 = vsel %vm856_vm7, %v863_v37, 2147483647 }
 0x68e   :  { %v866_v41 = vshra.s32 %v864_v38, 16  ;;  %v865_v43 = vand.u32 65535, %v864_v38 }
 0x690   :  { %v868_v42 = vcvt.s32.f32 %v866_v41  ;;  %v867_v49 = vcvt.s32.f32 %v865_v43 }
 0x692   :  { %869 = vmin.xlane.f32.xlu1 %v868_v42 }
 0x71f   :  { %v870_v47 = vpop.xlane.xlu1 %869 }
 0x720   :  { %vm871_vm9 = vcmp.eq.f32.partialorder %v868_v42, %v870_v47  ;;  %v876_v53 = vcvt.f32.s32 %v870_v47 }
 0x721   :  { %v872_v50 = vsel %vm871_vm9, %v867_v49, inf }
 0x722   :  { %873 = vmin.xlane.f32.xlu0 %v872_v50  ;;  %v877_v57 = vshll.u32 %v876_v53, 16 }
 0x7af   :  { %v874_v56 = vpop.xlane.xlu0 %873 }
 0x7b0   :  { %v875_v58 = vcvt.f32.s32 %v874_v56 }
 0x7b2   :  { %v3356_v59 = vadd.s32 %v877_v57, %v875_v58 }
 0x7b4   :  { %vm879_vm10 = vcmp.eq.s32.totalorder %v861_v31, %v3356_v59 }
 0x7b5   :  { %v2499_v60 = vsel %vm879_vm10, 1.0, %v3110_v20 }
 0x7b6   :  { %2778 = vmatmul.mubr.msk.f32.vlgmr.msra.gmra.mrb[6].mxu0 %vm856_vm7, %v2499_v60 }
 0x7b7   :  { %2983 = vmatpush3.bf16.xpose.msk.msra.mxu0 %vm3244_vm3, %v3248_v40  ;;  %2795 = vmatprep.mubr.msk.f32.mxu0 %vm3109_vm1, %v3110_v20 }
 0x7b8   :  { %2987 = vmatprep.subr.bf16.mxu0 %v3108_v19 }
 0x889   :  { %v3368_v62 = vpop.f32.mrb[6].mxu0 }
 0x88a   :  { %v970_v0 = vadd.f32 1.0, %v3368_v62  ;;  %v2779_v2 = vpop.f32.mrb[7].mxu0  ;;  %v3375_v3 = vsub.f32 %v3368_v62, %v3344_v21 }
 0x88c   :  { %v971_v40 = vmul.f32 %v970_v0, %v969_v63 }
 0x88e   :  { %2789 = vmatmul.mubr.msk.f32.vlgmr.msra.gmra.mrb[16].mxu1 %vm130_vm2, %v971_v40 }
 0x88f   :  { %2986 = vmatpush3.bf16.msra.mxu1 %v3269_v54  ;;  %2802 = vmatprep.mubr.msk.f32.mxu1 %vm3109_vm1, %v3110_v20 }
 0x890   :  { %2991 = vmatprep.subr.bf16.mxu1 %v3108_v19 }
 0x961   :  { %v1041_v4 = vpop.f32.mrb[16].mxu1 }
 0x962   :  { %v2790_v5 = vpop.f32.mrb[17].mxu1  ;;  %2796 = vmatmul.mubr.msk.f32.vlgmr.msra.gmra.mrb[8].mxu0 %vm130_vm2, %v1041_v4  ;;  %v1218_v36 = vrot.slane %v1041_v4, 4 }
 0x963   :  { %2990 = vmatpush3.bf16.xpose.msk.msra.mxu0 %vm3244_vm3, %v3255_v45  ;;  %2809 = vmatprep.mubr.msk.f32.mxu0 %vm3109_vm1, %v3110_v20  ;;  %vm2458_vm3 = vcmask 785408  }
 0x96a   :  { %2810 = vmatmul.mubr.msk.f32.vlgmr.msra.gmra.mrb[10].mxu0 %vm130_vm2, %v1218_v36 }
 0xa35   :  { %v1114_v54 = vpop.f32.mrb[8].mxu0 }
 0xa36   :  { %v1118_v8 = vmul.f32 0.17677669, %v1114_v54  ;;  %v2797_v9 = vpop.f32.mrb[9].mxu0 }
 0xa38   :  { %v1119_v11 = vadd.f32 %v1118_v8, %v417_v48 }
 0xa3a   :  { %v1120_v12 = vsel %vm395_vm5, %v1119_v11, -inf }
 0xa3b   :  { %v1121_v14 = vrot.slane %v1120_v12, 4 }
 0xa3d   :  { %v1122_v15 = vmax.f32 %v1120_v12, %v1121_v14  ;;  %v1287_v16 = vpop.f32.mrb[10].mxu0 }
 0xa3e   :  { %v1291_v39 = vmul.f32 0.17677669, %v1287_v16  ;;  %v2811_v45 = vpop.f32.mrb[11].mxu0 }
 0xa3f   :  { %v1123_v17 = vrot.slane %v1122_v15, 2 }
 0xa40   :  { %v1292_v18 = vadd.f32 %v1291_v39, %v605_v55 }
 0xa41   :  { %v1124_v22 = vmax.f32 %v1122_v15, %v1123_v17 }
 0xa42   :  { %v1293_v27 = vsel %vm395_vm5, %v1292_v18, -inf }
 0xa43   :  { %v1125_v23 = vrot.slane %v1124_v22, 1  ;;  %v1294_v34 = vrot.slane %v1293_v27, 4 }
 0xa45   :  { %v1126_v24 = vmax.f32 %v1124_v22, %v1125_v23  ;;  %v1295_v7 = vmax.f32 %v1293_v27, %v1294_v34  ;;  %v1473_v27 = vld [vmem:[%s3761_s1 + $0x128] sm:$0xff]  ;;  %v1474_v34 = vld [vmem:[%s3761_s1 + $0x130] sm:$0xff] }
 0xa47   :  { %v1127_v46 = vsub.f32 %v1119_v11, %v1126_v24  ;;  %v1296_v48 = vrot.slane %v1295_v7, 2  ;;  %v1475_v24 = vld [vmem:[%s3761_s1 + $0x138] sm:$0xff] }
 0xa49   :  { %v1128_v25 = vmul.f32 1.442695, %v1127_v46  ;;  %v1297_v29 = vmax.f32 %v1295_v7, %v1296_v48  ;;  %v1476_v7 = vld [vmem:[%s3761_s1 + $0x140] sm:$0xff]  ;;  %v1477_v46 = vld [vmem:[%s3761_s1 + $0x148] sm:$0xff]  ;;  %v1478_v48 = vld [vmem:[%s3761_s1 + $0x150] sm:$0xff] }
 0xa4b   :  { %3080 = vpow2.f32 %v1128_v25  ;;  %v1298_v30 = vrot.slane %v1297_v29, 1  ;;  %v1479_v25 = vld [vmem:[%s3761_s1 + $0x158] sm:$0xff] }
 0xa4d   :  { %v1299_v31 = vmax.f32 %v1297_v29, %v1298_v30  ;;  %v1480_v29 = vld [vmem:[%s3761_s1 + $0x160] sm:$0xff]  ;;  %v1481_v30 = vld [vmem:[%s3761_s1 + $0x168] sm:$0xff] }
 0xa4f   :  { %v1300_v32 = vsub.f32 %v1292_v18, %v1299_v31  ;;  %v1482_v31 = vld [vmem:[%s3761_s1 + $0x170] sm:$0xff] }
 0xa51   :  { %v1301_v37 = vmul.f32 1.442695, %v1300_v32  ;;  %v1483_v32 = vld [vmem:[%s3761_s1 + $0x178] sm:$0xff] }
 0xa53   :  { %3082 = vpow2.f32 %v1301_v37  ;;  %v1484_v37 = vld [vmem:[%s3761_s1 + $0x180] sm:$0xff] }
 0xa55   :  { %v3081_v38 = vpop.eup %3080 }
 0xa56   :  { %v1130_v13 = vsel %vm395_vm5, %v3081_v38, 0.0 }
 0xa57   :  { %v1131_v52 = vrot.slane %v1130_v13, 4 }
 0xa59   :  { %v1132_v55 = vadd.f32 %v1131_v52, %v1130_v13  ;;  %v1486_v13 = vld [vmem:[%s3761_s1 + $0x190] sm:$0xff]  ;;  %v1487_v52 = vld [vmem:[%s3761_s1 + $0x198] sm:$0xff] }
 0xa5b   :  { %v1133_v41 = vrot.slane %v1132_v55, 2 }
 0xa5d   :  { %v3083_v42 = vpop.eup %3082  ;;  %v1134_v43 = vadd.f32 %v1133_v41, %v1132_v55  ;;  %v1699_v55 = vld [vmem:[%s3761_s1 + $0xc0] sm:$0xff]  ;;  %v1700_v41 = vld [vmem:[%s3761_s1 + $0xc8] sm:$0xff] }
 0xa5e   :  { %v1303_v47 = vsel %vm395_vm5, %v3083_v42, 0.0 }
 0xa5f   :  { %v1304_v49 = vrot.slane %v1303_v47, 4  ;;  %v1135_v50 = vrot.slane %v1134_v43, 1 }
 0xa61   :  { %v1305_v53 = vadd.f32 %v1304_v49, %v1303_v47  ;;  %v1136_v56 = vadd.f32 %v1135_v50, %v1134_v43  ;;  %v1915_v43 = vld [vmem:[%s3761_s1 + $0xd8] sm:$0xff]  ;;  %v1916_v47 = vld [vmem:[%s3761_s1 + $0xe0] sm:$0xff]  ;;  %v1917_v49 = vld [vmem:[%s3761_s1 + $0xe8] sm:$0xff] }
 0xa62   :  { %v3008_v50 = vpack.c.bf16 %v1916_v47, %v1915_v43  ;;  %v1503_v43 = vld [vmem:[%s3761_s1 + $0x218] sm:$0xff]  ;;  %v1502_v47 = vld [vmem:[%s3761_s1 + $0x210] sm:$0xff] }
 0xa63   :  { %v1306_v57 = vrot.slane %v1305_v53, 2  ;;  %3084 = vrcp.f32 %v1136_v56 }
 0xa65   :  { %v1307_v58 = vadd.f32 %v1306_v57, %v1305_v53  ;;  %v1918_v53 = vld [vmem:[%s3761_s1 + $0xf0] sm:$0xff]  ;;  %v1919_v57 = vld [vmem:[%s3761_s1 + $0xf8] sm:$0xff] }
 0xa66   :  { %v3012_v56 = vpack.c.bf16 %v1918_v53, %v1917_v49 }
 0xa67   :  { %v1308_v60 = vrot.slane %v1307_v58, 1 }
 0xa69   :  { %v1309_v61 = vadd.f32 %v1308_v60, %v1307_v58  ;;  %v1920_v58 = vld [vmem:[%s3761_s1 + $0x100] sm:$0xff] }
 0xa6a   :  { %v3016_v60 = vpack.c.bf16 %v1920_v58, %v1919_v57  ;;  %v1921_v57 = vld [vmem:[%s3761_s1 + $0x108] sm:$0xff]  ;;  %v1922_v58 = vld [vmem:[%s3761_s1 + $0x110] sm:$0xff] }
 0xa6b   :  { %3086 = vrcp.f32 %v1309_v61  ;;  %v1488_v61 = vld [vmem:[%s3761_s1 + $0x1a0] sm:$0xff] }
 0xa6d   :  { %v3085_v63 = vpop.eup %3084 }
 0xa6e   :  { %v3399_v0 = vmul.f32 %v3085_v63, %v3081_v38  ;;  %v1485_v38 = vld [vmem:[%s3761_s1 + $0x188] sm:$0xff] }
 0xa6f   :  { %v1489_v63 = vld [vmem:[%s3761_s1 + $0x1a8] sm:$0xff] }
 0xa70   :  { %v1139_v2 = vsel %vm395_vm5, %v3399_v0, 0.0 }
 0xa71   :  { %1140 = vadd.xlane.f32.xlu0 %v1139_v2 }
 0xa75   :  { %v3087_v40 = vpop.eup %3086 }
 0xa76   :  { %v3403_v4 = vmul.f32 %v3087_v40, %v3083_v42  ;;  %v3004_v42 = vpack.c.bf16 %v1700_v41, %v1699_v55 }
 0xa78   :  { %v1312_v5 = vsel %vm395_vm5, %v3403_v4, 0.0 }
 0xa79   :  { %1313 = vadd.xlane.f32.xlu0 %v1312_v5 }
 0xafe   :  { %v1141_v36 = vpop.xlane.xlu0 %1140 }
 0xaff   :  { %v1142_v54 = vadd.f32 1e-08, %v1141_v36  ;;  %v1491_v36 = vld [vmem:[%s3761_s1 + $0x1b8] sm:$0xff] }
 0xb01   :  { %3088 = vrcp.f32 %v1142_v54 }
 0xb06   :  { %v1314_v8 = vpop.xlane.xlu0 %1313 }
 0xb07   :  { %v1315_v9 = vadd.f32 1e-08, %v1314_v8  ;;  %v1490_v8 = vld [vmem:[%s3761_s1 + $0x1b0] sm:$0xff] }
 0xb09   :  { %3090 = vrcp.f32 %v1315_v9 }
 0xb0b   :  { %v3089_v11 = vpop.eup %3088 }
 0xb0c   :  { %v1144_v12 = vmul.f32 %v3089_v11, %v3399_v0 }
 0xb0e   :  { %2803 = vmatmul.mubr.msk.f32.vlgmr.msra.gmra.mrb[18].mxu1 %vm430_vm6, %v1144_v12 }
 0xb0f   :  { %2993 = vmatpush3.bf16.msra.mxu1 %v3300_v1  ;;  %2816 = vmatprep.mubr.msk.f32.mxu1 %vm3109_vm1, %v3110_v20 }
 0xb10   :  { %2994 = vmatprep.subr.bf16.mxu1 %v3108_v19 }
 0xb13   :  { %v3091_v14 = vpop.eup %3090 }
 0xb14   :  { %v1317_v15 = vmul.f32 %v3091_v14, %v3403_v4 }
 0xb16   :  { %2817 = vmatmul.mubr.msk.f32.vlgmr.msra.gmra.mrb[20].mxu1 %vm430_vm6, %v1317_v15  ;;  %v1493_v15 = vld [vmem:[%s3761_s1 + $0x1c8] sm:$0xff] }
 0xb17   :  { %2996 = vmatpush3.bf16.msra.mxu1 %v3317_v6  ;;  %2827 = vmatprep.mubr.msk.f32.mxu1 %vm3109_vm1, %v3110_v20  ;;  %v1472_v6 = vld [vmem:[%s3761_s1 + $0x120] sm:$0xff]  ;;  %v1698_v20 = vld [vmem:[%s3761_s1 + $0xb8] sm:$0xff]  ;;  %vm2465_vm1 = vcmask 146432  }
 0xb18   :  { %2997 = vmatprep.subr.bf16.mxu1 %v3108_v19  ;;  %2832 = vmatprep.mubr.msk.f32.mxu0 %vm856_vm7, %v1472_v6  ;;  %v1697_v19 = vld [vmem:[%s3761_s1 + $0xb0] sm:$0xff] }
 0xb19   :  { %v1494_v6 = vld [vmem:[%s3761_s1 + $0x1d0] sm:$0xff] }
 0xb1b   :  { %2999 = vmatpush3.bf16.msra.mxu1 %v3327_v10  ;;  %v3000_v10 = vpack.c.bf16 %v1698_v20, %v1697_v19 }
 0xb1d   :  { %3001 = vmatprep.subr.bf16.mxu1 %v3000_v10 }
 0xbe1   :  { %v1214_v1 = vpop.f32.mrb[18].mxu1 }
 0xbe2   :  { %v2804_v16 = vpop.f32.mrb[19].mxu1 }
 0xbe9   :  { %v1387_v39 = vpop.f32.mrb[20].mxu1 }
 0xbea   :  { %v1392_v45 = vrot.slane %v1387_v39, 4  ;;  %v2818_v17 = vpop.f32.mrb[21].mxu1 }
 0xbec   :  { %v1394_v18 = vsel %vm313_vm4, %v1214_v1, %v1392_v45  ;;  %v1492_v1 = vld [vmem:[%s3761_s1 + $0x1c0] sm:$0xff] }
 0xbed   :  { %2828 = vmatmul.mubr.msk.f32.vlgmr.msra.gmra.mrb[22].mxu1 %vm130_vm2, %v1394_v18  ;;  %v1495_v18 = vld [vmem:[%s3761_s1 + $0x1d8] sm:$0xff] }
 0xbee   :  { %3003 = vmatpush3.bf16.msra.mxu1 %v3000_v10 }
 0xbef   :  { %3005 = vmatprep.subr.bf16.mxu1 %v3004_v42 }
 0xbf2   :  { %3007 = vmatpush3.bf16.msra.mxu1 %v3004_v42 }
 0xcc0   :  { %v3432_v22 = vpop.f32.mrb[22].mxu1 }
 0xcc1   :  { %v2829_v23 = vpop.f32.mrb[23].mxu1  ;;  %2830 = vmatprep.subr.mxu0 %v3432_v22 }
 0xcc2   :  { %2831 = vmatpush3.msra.mxu0 %v3432_v22  ;;  %v1497_v23 = vld [vmem:[%s3761_s1 + $0x1e8] sm:$0xff] }
 0xcc3   :  { %2833 = vmatmul.mubr.msk.f32.vlgmr.msra.gmra.mrb[12].mxu0 %vm856_vm7, %v1473_v27  ;;  %3009 = vmatprep.subr.bf16.mxu0 %v3008_v50 }
 0xcc4   :  { %2835 = vmatprep.mubr.msk.f32.mxu0 %vm856_vm7, %v1474_v34  ;;  %3011 = vmatpush3.bf16.msra.mxu0 %v3008_v50  ;;  %v1496_v34 = vld [vmem:[%s3761_s1 + $0x1e0] sm:$0xff] }
 0xcc5   :  { %3013 = vmatprep.subr.bf16.mxu0 %v3012_v56 }
 0xcc7   :  { %2836 = vmatmul.mubr.msk.f32.gmra.mrb[14].mxu0 %vm856_vm7, %v1475_v24 }
 0xcc8   :  { %2838 = vmatprep.mubr.msk.f32.mxu0 %vm856_vm7, %v1476_v7  ;;  %3015 = vmatpush3.bf16.msra.mxu0 %v3012_v56 }
 0xcc9   :  { %3017 = vmatprep.subr.bf16.mxu0 %v3016_v60 }
 0xccb   :  { %2839 = vmatmul.mubr.msk.f32.gmra.mrb[16].mxu0 %vm856_vm7, %v1477_v46 }
 0xccc   :  { %2841 = vmatprep.mubr.msk.f32.mxu0 %vm856_vm7, %v1478_v48  ;;  %3019 = vmatpush3.bf16.msra.mxu0 %v3016_v60  ;;  %v3020_v60 = vpack.c.bf16 %v1922_v58, %v1921_v57  ;;  %v2544_v58 = vld [vmem:[%s3761_s1 + $0x118] ss:$0 sm:$0xff] }
 0xcce   :  { %3021 = vmatprep.subr.bf16.mxu0 %v3020_v60 }
 0xccf   :  { %2842 = vmatmul.mubr.msk.f32.gmra.mrb[18].mxu0 %vm856_vm7, %v1479_v25  ;;  %v1499_v25 = vld [vmem:[%s3761_s1 + $0x1f8] sm:$0xff] }
 0xcd0   :  { %2844 = vmatprep.mubr.msk.f32.mxu0 %vm856_vm7, %v1480_v29  ;;  %v1498_v29 = vld [vmem:[%s3761_s1 + $0x1f0] sm:$0xff]  ;;  %3023 = vmatpush3.bf16.msra.mxu0 %v3020_v60 }
 0xcd3   :  { %2845 = vmatmul.mubr.msk.f32.gmra.mrb[20].mxu0 %vm856_vm7, %v1481_v30 }
 0xcd4   :  { %2847 = vmatprep.mubr.msk.f32.mxu0 %vm856_vm7, %v1482_v31 }
 0xcd7   :  { %2848 = vmatmul.mubr.msk.f32.gmra.mrb[22].mxu0 %vm856_vm7, %v1483_v32 }
 0xcd8   :  { %2850 = vmatprep.mubr.msk.f32.mxu0 %vm856_vm7, %v1484_v37 }
 0xcdb   :  { %2851 = vmatmul.mubr.msk.f32.gmra.mrb[24].mxu0 %vm856_vm7, %v1485_v38  ;;  %v1501_v38 = vld [vmem:[%s3761_s1 + $0x208] sm:$0xff] }
 0xcdc   :  { %2853 = vmatprep.mubr.msk.f32.mxu0 %vm856_vm7, %v1486_v13  ;;  %v1500_v13 = vld [vmem:[%s3761_s1 + $0x200] sm:$0xff] }
 0xcdf   :  { %2854 = vmatmul.mubr.msk.f32.gmra.mrb[26].mxu0 %vm856_vm7, %v1487_v52 }
 0xd96   :  { %v2834_v2 = vpop.f32.mrb[12].mxu0 }
 0xd97   :  { %v1618_v40 = vpop.f32.mrb[13].mxu0  ;;  %v1624_v54 = vadd.f32 %v2834_v2, %v1489_v63 }
 0xd98   :  { %v1619_v5 = vadd.f32 %v1618_v40, %v1488_v61  ;;  %v2527_v61 = vld [vmem:[%s3761_s1 + $0xd0] ss:$0 sm:$0xff]  ;;  %s3113_s1 = smov 98  }
 0xd9a   :  { %v2837_v9 = vpop.f32.mrb[14].mxu0  ;;  %2864 = vmatprep.mubr.msk.f32.mxu1 %vm130_vm2, %v1619_v5 }
 0xd9b   :  { %v1634_v11 = vadd.f32 %v2837_v9, %v1491_v36  ;;  %v1628_v12 = vpop.f32.mrb[15].mxu0  ;;  %2865 = vmatmul.mubr.msk.f32.vlgmr.msra.gmra.mrb[24].mxu1 %vm130_vm2, %v1624_v54 }
 0xd9c   :  { %v1629_v14 = vadd.f32 %v1628_v12, %v1490_v8 }
 0xd9e   :  { %v2840_v16 = vpop.f32.mrb[16].mxu0  ;;  %2867 = vmatprep.mubr.msk.f32.mxu1 %vm130_vm2, %v1629_v14 }
 0xd9f   :  { %v1644_v39 = vadd.f32 %v2840_v16, %v1493_v15  ;;  %v1638_v45 = vpop.f32.mrb[17].mxu0  ;;  %2868 = vmatmul.mubr.msk.f32.gmra.mrb[26].mxu1 %vm130_vm2, %v1634_v11 }
 0xda0   :  { %v1639_v17 = vadd.f32 %v1638_v45, %v1492_v1 }
 0xda2   :  { %v2843_v19 = vpop.f32.mrb[18].mxu0  ;;  %2870 = vmatprep.mubr.msk.f32.mxu1 %vm130_vm2, %v1639_v17 }
 0xda3   :  { %v1654_v20 = vadd.f32 %v2843_v19, %v1495_v18  ;;  %v1648_v10 = vpop.f32.mrb[19].mxu0  ;;  %2871 = vmatmul.mubr.msk.f32.gmra.mrb[28].mxu1 %vm130_vm2, %v1644_v39 }
 0xda4   :  { %v1649_v27 = vadd.f32 %v1648_v10, %v1494_v6 }
 0xda6   :  { %v2846_v24 = vpop.f32.mrb[20].mxu0  ;;  %2873 = vmatprep.mubr.msk.f32.mxu1 %vm130_vm2, %v1649_v27 }
 0xda7   :  { %v1664_v7 = vadd.f32 %v2846_v24, %v1497_v23  ;;  %v1658_v46 = vpop.f32.mrb[21].mxu0  ;;  %2874 = vmatmul.mubr.msk.f32.gmra.mrb[30].mxu1 %vm130_vm2, %v1654_v20 }
 0xda8   :  { %v1659_v48 = vadd.f32 %v1658_v46, %v1496_v34 }
 0xdaa   :  { %v2849_v30 = vpop.f32.mrb[22].mxu0  ;;  %2876 = vmatprep.mubr.msk.f32.mxu1 %vm130_vm2, %v1659_v48 }
 0xdab   :  { %v1674_v31 = vadd.f32 %v2849_v30, %v1499_v25  ;;  %v1668_v32 = vpop.f32.mrb[23].mxu0  ;;  %2877 = vmatmul.mubr.msk.f32.gmra.mrb[32].mxu1 %vm130_vm2, %v1664_v7 }
 0xdac   :  { %v1669_v37 = vadd.f32 %v1668_v32, %v1498_v29 }
 0xdae   :  { %v2852_v52 = vpop.f32.mrb[24].mxu0  ;;  %2879 = vmatprep.mubr.msk.f32.mxu1 %vm130_vm2, %v1669_v37 }
 0xdaf   :  { %v1684_v55 = vadd.f32 %v2852_v52, %v1501_v38  ;;  %v1678_v41 = vpop.f32.mrb[25].mxu0  ;;  %2880 = vmatmul.mubr.msk.f32.gmra.mrb[34].mxu1 %vm130_vm2, %v1674_v31 }
 0xdb0   :  { %v1679_v42 = vadd.f32 %v1678_v41, %v1500_v13 }
 0xdb2   :  { %v2855_v49 = vpop.f32.mrb[26].mxu0  ;;  %2882 = vmatprep.mubr.msk.f32.mxu1 %vm130_vm2, %v1679_v42 }
 0xdb3   :  { %v1694_v50 = vadd.f32 %v2855_v49, %v1503_v43  ;;  %v1688_v53 = vpop.f32.mrb[27].mxu0  ;;  %2883 = vmatmul.mubr.msk.f32.gmra.mrb[36].mxu1 %vm130_vm2, %v1684_v55 }
 0xdb4   :  { %v1689_v56 = vadd.f32 %v1688_v53, %v1502_v47 }
 0xdb6   :  { %2885 = vmatprep.mubr.msk.f32.mxu1 %vm130_vm2, %v1689_v56 }
 0xdb7   :  { %2886 = vmatmul.mubr.msk.f32.gmra.mrb[38].mxu1 %vm130_vm2, %v1694_v50 }
 0xe6e   :  { %v2866_v63 = vpop.f32.mrb[24].mxu1 }
 0xe6f   :  { %v1826_v2 = vadd.f32 %v2866_v63, %v2527_v61  ;;  %v1820_v40 = vpop.f32.mrb[25].mxu1 }
 0xe70   :  { %v1821_v5 = vadd.f32 %v2527_v61, %v1820_v40 }
 0xe71   :  { %v1900_v8 = vmax.f32 %v1826_v2, 0.0 }
 0xe72   :  { %v1899_v36 = vmax.f32 %v1821_v5, 0.0  ;;  %v2869_v54 = vpop.f32.mrb[26].mxu1 }
 0xe73   :  { %v1836_v9 = vadd.f32 %v2869_v54, %v2527_v61  ;;  %v1830_v11 = vpop.f32.mrb[27].mxu1 }
 0xe74   :  { %v1831_v12 = vadd.f32 %v2527_v61, %v1830_v11  ;;  %2904 = vmatprep.mubr.msk.f32.mxu0 %vm1928_vm11, %v1899_v36 }
 0xe75   :  { %2905 = vmatmul.mubr.msk.f32.vlgmr.msra.gmra.mrb[28].mxu0 %vm1928_vm11, %v1900_v8  ;;  %v1902_v1 = vmax.f32 %v1836_v9, 0.0 }
 0xe76   :  { %v1901_v14 = vmax.f32 %v1831_v12, 0.0  ;;  %v2872_v15 = vpop.f32.mrb[28].mxu1 }
 0xe77   :  { %v1846_v16 = vadd.f32 %v2872_v15, %v2527_v61  ;;  %v1840_v39 = vpop.f32.mrb[29].mxu1 }
 0xe78   :  { %v1841_v45 = vadd.f32 %v2527_v61, %v1840_v39  ;;  %2907 = vmatprep.mubr.msk.f32.mxu0 %vm1928_vm11, %v1901_v14 }
 0xe79   :  { %v1904_v17 = vmax.f32 %v1846_v16, 0.0  ;;  %2908 = vmatmul.mubr.msk.f32.gmra.mrb[30].mxu0 %vm1928_vm11, %v1902_v1 }
 0xe7a   :  { %v1903_v18 = vmax.f32 %v1841_v45, 0.0  ;;  %v2875_v6 = vpop.f32.mrb[30].mxu1 }
 0xe7b   :  { %v1856_v19 = vadd.f32 %v2875_v6, %v2527_v61  ;;  %v1850_v20 = vpop.f32.mrb[31].mxu1 }
 0xe7c   :  { %v1851_v10 = vadd.f32 %v2527_v61, %v1850_v20  ;;  %2910 = vmatprep.mubr.msk.f32.mxu0 %vm1928_vm11, %v1903_v18 }
 0xe7d   :  { %v1906_v27 = vmax.f32 %v1856_v19, 0.0  ;;  %2911 = vmatmul.mubr.msk.f32.gmra.mrb[32].mxu0 %vm1928_vm11, %v1904_v17 }
 0xe7e   :  { %v1905_v23 = vmax.f32 %v1851_v10, 0.0  ;;  %v2878_v34 = vpop.f32.mrb[32].mxu1 }
 0xe7f   :  { %v1866_v24 = vadd.f32 %v2878_v34, %v2527_v61  ;;  %v1860_v7 = vpop.f32.mrb[33].mxu1 }
 0xe80   :  { %v1861_v46 = vadd.f32 %v2527_v61, %v1860_v7  ;;  %2913 = vmatprep.mubr.msk.f32.mxu0 %vm1928_vm11, %v1905_v23 }
 0xe81   :  { %v1908_v48 = vmax.f32 %v1866_v24, 0.0  ;;  %2914 = vmatmul.mubr.msk.f32.gmra.mrb[34].mxu0 %vm1928_vm11, %v1906_v27 }
 0xe82   :  { %v1907_v25 = vmax.f32 %v1861_v46, 0.0  ;;  %v2881_v29 = vpop.f32.mrb[34].mxu1 }
 0xe83   :  { %v1876_v30 = vadd.f32 %v2881_v29, %v2527_v61  ;;  %v1870_v31 = vpop.f32.mrb[35].mxu1 }
 0xe84   :  { %v1871_v32 = vadd.f32 %v2527_v61, %v1870_v31  ;;  %2916 = vmatprep.mubr.msk.f32.mxu0 %vm1928_vm11, %v1907_v25 }
 0xe85   :  { %v1910_v37 = vmax.f32 %v1876_v30, 0.0  ;;  %2917 = vmatmul.mubr.msk.f32.gmra.mrb[36].mxu0 %vm1928_vm11, %v1908_v48 }
 0xe86   :  { %v1909_v38 = vmax.f32 %v1871_v32, 0.0  ;;  %v2884_v13 = vpop.f32.mrb[36].mxu1 }
 0xe87   :  { %v1886_v52 = vadd.f32 %v2884_v13, %v2527_v61  ;;  %v1880_v55 = vpop.f32.mrb[37].mxu1 }
 0xe88   :  { %v1881_v41 = vadd.f32 %v2527_v61, %v1880_v55  ;;  %2919 = vmatprep.mubr.msk.f32.mxu0 %vm1928_vm11, %v1909_v38 }
 0xe89   :  { %v1912_v42 = vmax.f32 %v1886_v52, 0.0  ;;  %2920 = vmatmul.mubr.msk.f32.gmra.mrb[38].mxu0 %vm1928_vm11, %v1910_v37 }
 0xe8a   :  { %v1911_v43 = vmax.f32 %v1881_v41, 0.0  ;;  %v2887_v47 = vpop.f32.mrb[38].mxu1 }
 0xe8b   :  { %v1896_v49 = vadd.f32 %v2887_v47, %v2527_v61  ;;  %v1890_v50 = vpop.f32.mrb[39].mxu1 }
 0xe8c   :  { %v1891_v53 = vadd.f32 %v2527_v61, %v1890_v50  ;;  %2922 = vmatprep.mubr.msk.f32.mxu0 %vm1928_vm11, %v1911_v43  ;;  %v956_v43 = vmul.f32 %v3375_v3, %v3375_v3 }
 0xe8d   :  { %v1914_v56 = vmax.f32 %v1896_v49, 0.0  ;;  %2923 = vmatmul.mubr.msk.f32.gmra.mrb[40].mxu0 %vm1928_vm11, %v1912_v42 }
 0xe8e   :  { %v1913_v57 = vmax.f32 %v1891_v53, 0.0 }
 0xe90   :  { %2925 = vmatprep.mubr.msk.f32.mxu0 %vm1928_vm11, %v1913_v57 }
 0xe91   :  { %2926 = vmatmul.mubr.msk.f32.gmra.mrb[42].mxu0 %vm1928_vm11, %v1914_v56  ;;  %v957_v56 = vsel %vm130_vm2, %v956_v43, 0.0 }
 0xf48   :  { %v2906_v60 = vpop.f32.mrb[28].mxu0 }
 0xf49   :  { %v3612_v63 = vadd.f32 %v2906_v60, %v2544_v58  ;;  %v2043_v2 = vpop.f32.mrb[29].mxu0 }
 0xf4a   :  { %v3614_v40 = vadd.f32 %v2544_v58, %v2043_v2 }
 0xf4b   :  { %2126 = vrot.lane.b32.xlu1 %v3612_v63, %s3111_s24 }
 0xf4c   :  { %v2909_v61 = vpop.f32.mrb[30].mxu0  ;;  %2124 = vrot.lane.b32.xlu0 %v3614_v40, %s3111_s24 }
 0xf4d   :  { %v3620_v5 = vadd.f32 %v2909_v61, %v2544_v58  ;;  %v2053_v36 = vpop.f32.mrb[31].mxu0 }
 0xf4e   :  { %v3624_v9 = vadd.f32 %v2544_v58, %v2053_v36 }
 0xf50   :  { %v2912_v54 = vpop.f32.mrb[32].mxu0  ;;  %2134 = vrot.lane.b32.xlu0 %v3620_v5, %s3112_s20 }
 0xf51   :  { %v2063_v8 = vpop.f32.mrb[33].mxu0  ;;  %v3632_v15 = vadd.f32 %v2912_v54, %v2544_v58 }
 0xf52   :  { %v3626_v11 = vadd.f32 %v2544_v58, %v2063_v8 }
 0xf54   :  { %v2915_v12 = vpop.f32.mrb[34].mxu0  ;;  %2140 = vrot.lane.b32.xlu1 %v3626_v11, %s3113_s1  ;;  %2132 = vrot.lane.b32.xlu0 %v3624_v9, %s3112_s20 }
 0xf55   :  { %v2073_v14 = vpop.f32.mrb[35].mxu0  ;;  %v3639_v45 = vadd.f32 %v2915_v12, %v2544_v58 }
 0xf56   :  { %v3634_v1 = vadd.f32 %v2544_v58, %v2073_v14 }
 0xf58   :  { %2148 = vrot.lane.b32.xlu1 %v3634_v1, %s3114_s21  ;;  %2142 = vrot.lane.b32.xlu0 %v3632_v15, %s3113_s1  ;;  %v2918_v16 = vpop.f32.mrb[36].mxu0 }
 0xf59   :  { %v2083_v39 = vpop.f32.mrb[37].mxu0  ;;  %v3641_v17 = vadd.f32 %v2918_v16, %v2544_v58 }
 0xf5a   :  { %v3646_v20 = vadd.f32 %v2544_v58, %v2083_v39 }
 0xf5c   :  { %v2921_v18 = vpop.f32.mrb[38].mxu0  ;;  %2150 = vrot.lane.b32.xlu0 %v3639_v45, %s3114_s21 }
 0xf5d   :  { %v2093_v6 = vpop.f32.mrb[39].mxu0  ;;  %v3654_v34 = vadd.f32 %v2921_v18, %v2544_v58 }
 0xf5e   :  { %v3644_v19 = vadd.f32 %v2544_v58, %v2093_v6 }
 0xf60   :  { %v2924_v10 = vpop.f32.mrb[40].mxu0  ;;  %2276 = vrot.lane.b32.xlu1 %v3644_v19, %s3112_s20  ;;  %2270 = vrot.lane.b32.xlu0 %v3641_v17, %s3111_s24 }
 0xf61   :  { %v2103_v27 = vpop.f32.mrb[41].mxu0  ;;  %v3662_v48 = vadd.f32 %v2924_v10, %v2544_v58 }
 0xf62   :  { %v3652_v23 = vadd.f32 %v2544_v58, %v2103_v27 }
 0xf64   :  { %v2927_v24 = vpop.f32.mrb[42].mxu0  ;;  %2284 = vrot.lane.b32.xlu1 %v3652_v23, %s3113_s1  ;;  %2268 = vrot.lane.b32.xlu0 %v3646_v20, %s3111_s24 }
 0xf65   :  { %v2113_v7 = vpop.f32.mrb[43].mxu0  ;;  %v3667_v25 = vadd.f32 %v2927_v24, %v2544_v58 }
 0xf66   :  { %v3660_v46 = vadd.f32 %v2544_v58, %v2113_v7 }
 0xf68   :  { %2292 = vrot.lane.b32.xlu1 %v3660_v46, %s3114_s21  ;;  %2278 = vrot.lane.b32.xlu0 %v3654_v34, %s3112_s20 }
 0xf6c   :  { %2286 = vrot.lane.b32.xlu0 %v3662_v48, %s3113_s1 }
 0xf70   :  { %2294 = vrot.lane.b32.xlu0 %v3667_v25, %s3114_s21 }
 0xfbd   :  { %v2127_v30 = vpop.permute.xlu1 %2126 }
 0xfbe   :  { %v2125_v29 = vpop.permute.xlu0 %2124 }
 0xfc2   :  { %v2135_v31 = vpop.permute.xlu0 %2134 }
 0xfc3   :  { %v2156_v47 = vsel %vm2154_vm12, %v2127_v30, %v2135_v31 }
 0xfc6   :  { %v2141_v32 = vpop.permute.xlu1 %2140  ;;  %v2133_v37 = vpop.permute.xlu0 %2132 }
 0xfc7   :  { %v2155_v38 = vsel %vm2154_vm12, %v2125_v29, %v2133_v37 }
 0xfc8   :  { %v2158_v55 = vsel %vm2157_vm13, %v2155_v38, %v2141_v32 }
 0xfca   :  { %v2149_v13 = vpop.permute.xlu1 %2148  ;;  %v2143_v52 = vpop.permute.xlu0 %2142 }
 0xfcb   :  { %v2161_v41 = vsel %vm2160_vm14, %v2158_v55, %v2149_v13  ;;  %v2159_v49 = vsel %vm2157_vm13, %v2156_v47, %v2143_v52 }
 0xfcc   :  { %v2164_v42 = vsel %vm2163_vm15, %v2161_v41, -inf }
 0xfcd   :  { %2165 = vmax.xlane.f32.xlu1 %v2164_v42 }
 0xfce   :  { %v2151_v50 = vpop.permute.xlu0 %2150 }
 0xfcf   :  { %v2162_v53 = vsel %vm2160_vm14, %v2159_v49, %v2151_v50 }
 0xfd0   :  { %v2167_v57 = vsel %vm2163_vm15, %v2162_v53, -inf }
 0xfd1   :  { %958 = vadd.xlane.f32.xlu1 %v957_v56  ;;  %2168 = vmax.xlane.f32.xlu0 %v2167_v57 }
 0xfd2   :  { %v2277_v58 = vpop.permute.xlu1 %2276  ;;  %v2271_v60 = vpop.permute.xlu0 %2270 }
 0xfd6   :  { %v2285_v2 = vpop.permute.xlu1 %2284  ;;  %v2269_v61 = vpop.permute.xlu0 %2268 }
 0xfd7   :  { %v2298_v3 = vsel %vm2154_vm12, %v2269_v61, %v2277_v58 }
 0xfd8   :  { %v2300_v36 = vsel %vm2157_vm13, %v2298_v3, %v2285_v2 }
 0xfda   :  { %v2293_v54 = vpop.permute.xlu1 %2292  ;;  %v2279_v8 = vpop.permute.xlu0 %2278 }
 0xfdb   :  { %v2302_v12 = vsel %vm2160_vm14, %v2300_v36, %v2293_v54  ;;  %v2299_v16 = vsel %vm2154_vm12, %v2271_v60, %v2279_v8  ;;  %v3115_v8 = vmov 3  }
 0xfdc   :  { %v2304_v14 = vsel %vm2163_vm15, %v2302_v12, -inf  ;;  %3053 = vset.pattern.permute.xlu0 %v3115_v8 }
 0xfdd   :  { %2305 = vmax.xlane.f32.xlu0 %v2304_v14  ;;  %v3116_v14 = vmov 0  }
 0xfde   :  { %v2287_v39 = vpop.permute.xlu0 %2286  ;;  %3050 = vset.pattern.permute.xlu1 %v3116_v14 }
 0xfdf   :  { %v2301_v18 = vsel %vm2157_vm13, %v2299_v16, %v2287_v39 }
 0xfe2   :  { %v2295_v6 = vpop.permute.xlu0 %2294 }
 0xfe3   :  { %v2303_v10 = vsel %vm2160_vm14, %v2301_v18, %v2295_v6 }
 0xfe4   :  { %v2307_v27 = vsel %vm2163_vm15, %v2303_v10, -inf }
 0xfe5   :  { %2308 = vmax.xlane.f32.xlu0 %v2307_v27  ;;  %v3117_v27 = vmov 1  }
0x105a   :  { %v2166_v24 = vpop.xlane.xlu1 %2165 }
0x105b   :  { %v2170_v7 = vsub.f32 %v2161_v41, %v2166_v24 }
0x105d   :  { %v2172_v29 = vmul.f32 1.442695, %v2170_v7  ;;  %v3118_v7 = vmov 2  }
0x105e   :  { %v959_v30 = vpop.xlane.xlu1 %958  ;;  %v2169_v31 = vpop.xlane.xlu0 %2168 }
0x105f   :  { %3092 = vpow2.f32 %v2172_v29  ;;  %v960_v32 = vrot.slane %v959_v30, 4  ;;  %v2171_v37 = vsub.f32 %v2162_v53, %v2169_v31 }
0x1061   :  { %v961_v38 = vadd.f32 %v960_v32, %v959_v30  ;;  %v2174_v13 = vmul.f32 1.442695, %v2171_v37 }
0x1063   :  { %v962_v52 = vrot.slane %v961_v38, 2  ;;  %3094 = vpow2.f32 %v2174_v13 }
0x1065   :  { %v963_v55 = vadd.f32 %v962_v52, %v961_v38  ;;  %v769_v38 = vrot.slane %v3291_v51, 4 }
0x1067   :  { %v964_v42 = vrot.slane %v963_v55, 1  ;;  %v771_v13 = vsel %vm313_vm4, %v3283_v44, %v769_v38 }
0x1069   :  { %v3093_v43 = vpop.eup %3092  ;;  %v965_v47 = vadd.f32 %v964_v42, %v963_v55 }
0x106a   :  { %v2176_v49 = vsel %vm2163_vm15, %v3093_v43, 0.0  ;;  %v2306_v41 = vpop.xlane.xlu0 %2305 }
0x106b   :  { %3024 = vpush %v965_v47  ;;  %2177 = vadd.xlane.f32.xlu0 %v2176_v49  ;;  %v2310_v57 = vsub.f32 %v2302_v12, %v2306_v41 }
0x106d   :  { %v3095_v50 = vpop.eup %3094  ;;  %v2312_v60 = vmul.f32 1.442695, %v2310_v57 }
0x106e   :  { %v2179_v56 = vsel %vm2163_vm15, %v3095_v50, 0.0 }
0x106f   :  { %2180 = vadd.xlane.f32.xlu1 %v2179_v56 }
0x1072   :  { %v2309_v58 = vpop.xlane.xlu0 %2308 }
0x1073   :  { %v2311_v53 = vsub.f32 %v2303_v10, %v2309_v58 }
0x1075   :  { %v2314_v2 = vmul.f32 1.442695, %v2311_v53 }
0x1077   :  { %3096 = vpow2.f32 %v2314_v2 }
0x1078   :  { %3098 = vpow2.f32 %v2312_v60 }
0x1081   :  { %v3097_v61 = vpop.eup %3096 }
0x1082   :  { %v2319_v3 = vsel %vm2163_vm15, %v3097_v61, 0.0  ;;  %v3099_v36 = vpop.eup %3098 }
0x1083   :  { %2320 = vadd.xlane.f32.xlu1 %v2319_v3  ;;  %v2316_v54 = vsel %vm2163_vm15, %v3099_v36, 0.0 }
0x1087   :  { %2317 = vadd.xlane.f32.xlu1 %v2316_v54 }
0x10f8   :  { %v2178_v12 = vpop.xlane.xlu0 %2177 }
0x10fc   :  { %v2181_v16 = vpop.xlane.xlu1 %2180 }
0x10fd   :  { %3100 = vrcp.f32 %v2181_v16 }
0x10fe   :  { %3102 = vrcp.f32 %v2178_v12 }
0x1107   :  { %v3101_v39 = vpop.eup %3100 }
0x1108   :  { %v2185_v18 = vmul.f32 %v3101_v39, %v3095_v50  ;;  %v3103_v6 = vpop.eup %3102 }
0x1109   :  { %v2183_v10 = vmul.f32 %v3103_v6, %v3093_v43 }
0x110a   :  { %2227 = vperm.xlu0 %3053, %v2185_v18   ;;  %2193 = vperm.xlu1 %3050, %v2185_v18  }
0x110e   :  { %3054 = vset.pattern.permute.xlu0 %v3116_v14  ;;  %3051 = vset.pattern.permute.xlu1 %v3117_v27 }
0x110f   :  { %2203 = vperm.xlu1 %3051, %v2185_v18   ;;  %2188 = vperm.xlu0 %3054, %v2183_v10  }
0x1110   :  { %v2321_v24 = vpop.xlane.xlu1 %2320 }
0x1111   :  { %3104 = vrcp.f32 %v2321_v24 }
0x1113   :  { %3052 = vset.pattern.permute.xlu1 %v3118_v7 }
0x1114   :  { %2215 = vperm.xlu1 %3052, %v2185_v18   ;;  %v2318_v30 = vpop.xlane.xlu1 %2317 }
0x1115   :  { %3106 = vrcp.f32 %v2318_v30 }
0x1118   :  { %3055 = vset.pattern.permute.xlu1 %v3117_v27 }
0x1119   :  { %2199 = vperm.xlu1 %3055, %v2183_v10  }
0x111b   :  { %v3105_v29 = vpop.eup %3104 }
0x111c   :  { %v2325_v31 = vmul.f32 %v3105_v29, %v3097_v61 }
0x111d   :  { %3056 = vset.pattern.permute.xlu1 %v3118_v7 }
0x111e   :  { %2211 = vperm.xlu1 %3056, %v2183_v10   ;;  %2333 = vperm.xlu0 %3054, %v2325_v31  }
0x111f   :  { %v3107_v32 = vpop.eup %3106 }
0x1120   :  { %v2323_v37 = vmul.f32 %v3107_v32, %v3099_v36 }
0x1122   :  { %3057 = vset.pattern.permute.xlu1 %v3115_v8  ;;  %3058 = vset.pattern.permute.xlu0 %v3117_v27 }
0x1123   :  { %2223 = vperm.xlu1 %3057, %v2183_v10   ;;  %2343 = vperm.xlu0 %3058, %v2325_v31  }
0x1127   :  { %3059 = vset.pattern.permute.xlu0 %v3118_v7 }
0x1128   :  { %2355 = vperm.xlu0 %3059, %v2325_v31  }
0x112c   :  { %3060 = vset.pattern.permute.xlu0 %v3116_v14 }
0x112d   :  { %2328 = vperm.xlu0 %3060, %v2323_v37  }
0x1131   :  { %3061 = vset.pattern.permute.xlu0 %v3117_v27 }
0x1132   :  { %2339 = vperm.xlu0 %3061, %v2323_v37  }
0x1136   :  { %3062 = vset.pattern.permute.xlu0 %v3118_v7 }
0x1137   :  { %2351 = vperm.xlu0 %3062, %v2323_v37  }
0x113b   :  { %3063 = vset.pattern.permute.xlu0 %v3115_v8 }
0x113c   :  { %2363 = vperm.xlu0 %3063, %v2323_v37  }
0x114c   :  { %2234 = vxpose.xlu1.b32.start [1/2] (short) (narrow) %v2183_v10, 8 }
0x1150   :  { %2235 = vxpose.xlu1.b32.end [2/2] (short) (narrow) %v2185_v18, 8 }
0x115a   :  { %2374 = vxpose.xlu0.b32.start [1/2] (short) (narrow) %v2323_v37, 8 }
0x115e   :  { %2375 = vxpose.xlu0.b32.end [2/2] (short) (narrow) %v2325_v31, 8 }
0x116e   :  { %2367 = vperm.xlu1 %3057, %v2325_v31  }
0x1172   :  { %2441 = vrot.lane.b32.xlu1 %v3432_v22, %s3119_s22 }
0x1176   :  { %2445 = vrot.lane.b32.xlu1 %v3368_v62, %s3120_s23 }
0x117a   :  { %2449 = vrot.lane.b32.xlu1 %v771_v13, %s3111_s24  ;;  %s3025_s24 = spop %3024 }
0x1189   :  { %v2194_v52 = vpop.permute.xlu1 %2193  ;;  %v2228_v47 = vpop.permute.xlu0 %2227 }
0x118a   :  { %v2197_v43 = vmul.f32 %v2194_v52, %v3612_v63  ;;  %v2231_v51 = vmul.f32 %v2228_v47, %v3639_v45 }
0x118e   :  { %v2204_v55 = vpop.permute.xlu1 %2203  ;;  %v2189_v44 = vpop.permute.xlu0 %2188 }
0x118f   :  { %v2207_v42 = vmul.f32 %v2204_v55, %v3620_v5  ;;  %v2196_v5 = vmul.f32 %v2189_v44, %v3614_v40 }
0x1191   :  { %v2209_v50 = vadd.f32 %v2207_v42, %v2197_v43  ;;  %v1469_v43 = vrot.slane %v3403_v4, 4 }
0x1193   :  { %v2216_v49 = vpop.permute.xlu1 %2215 }
0x1194   :  { %v2219_v22 = vmul.f32 %v2216_v49, %v3632_v15 }
0x1196   :  { %v2221_v41 = vadd.f32 %v2219_v22, %v2209_v50 }
0x1198   :  { %v2200_v62 = vpop.permute.xlu1 %2199  ;;  %v2233_v56 = vadd.f32 %v2231_v51, %v2221_v41 }
0x1199   :  { %v2206_v57 = vmul.f32 %v2200_v62, %v3624_v9 }
0x119a   :  { %2416 = vrot.lane.b32.xlu0 %v2233_v56, %s3119_s22 }
0x119b   :  { %v2208_v53 = vadd.f32 %v2206_v57, %v2196_v5 }
0x119d   :  { %v2212_v58 = vpop.permute.xlu1 %2211  ;;  %v2334_v45 = vpop.permute.xlu0 %2333 }
0x119e   :  { %v2218_v63 = vmul.f32 %v2212_v58, %v3626_v11  ;;  %v2438_v11 = vcvt.s32.f32 %v3356_v59  ;;  %v2337_v24 = vmul.f32 %v2334_v45, %v3641_v17 }
0x11a0   :  { %v2220_v2 = vadd.f32 %v2218_v63, %v2208_v53 }
0x11a2   :  { %v2224_v60 = vpop.permute.xlu1 %2223  ;;  %v2344_v3 = vpop.permute.xlu0 %2343 }
0x11a3   :  { %v2230_v15 = vmul.f32 %v2224_v60, %v3634_v1  ;;  %v2439_v1 = vstv %s3025_s24  ;;  %v2347_v27 = vmul.f32 %v2344_v3, %v3654_v34 }
0x11a5   :  { %v2232_v61 = vadd.f32 %v2230_v15, %v2220_v2  ;;  %v2349_v59 = vadd.f32 %v2347_v27, %v2337_v24 }
0x11a7   :  { %2414 = vrot.lane.b32.xlu1 %v2232_v61, %s3119_s22  ;;  %v2356_v36 = vpop.permute.xlu0 %2355 }
0x11a8   :  { %v2359_v7 = vmul.f32 %v2356_v36, %v3662_v48 }
0x11aa   :  { %v2361_v31 = vadd.f32 %v2359_v7, %v2349_v59 }
0x11ac   :  { %v2329_v54 = vpop.permute.xlu0 %2328 }
0x11ad   :  { %v2336_v32 = vmul.f32 %v2329_v54, %v3646_v20 }
0x11b1   :  { %v2340_v8 = vpop.permute.xlu0 %2339 }
0x11b2   :  { %v2346_v29 = vmul.f32 %v2340_v8, %v3644_v19 }
0x11b4   :  { %v2348_v13 = vadd.f32 %v2346_v29, %v2336_v32 }
0x11b6   :  { %v2352_v14 = vpop.permute.xlu0 %2351 }
0x11b7   :  { %v2358_v37 = vmul.f32 %v2352_v14, %v3652_v23 }
0x11b9   :  { %v2360_v42 = vadd.f32 %v2358_v37, %v2348_v13 }
0x11bb   :  { %v2364_v9 = vpop.permute.xlu0 %2363 }
0x11bc   :  { %v2370_v52 = vmul.f32 %v2364_v9, %v3660_v46  ;;  %v1471_v46 = vsel %vm313_vm4, %v3399_v0, %v1469_v43 }
0x11be   :  { %v2372_v19 = vadd.f32 %v2370_v52, %v2360_v42 }
0x11cc   :  { %v2250_v12 = vpop.trf.xlu1 }
0x11da   :  { %v2390_v16 = vpop.trf.xlu0 }
0x11db   :  { %v2407_v40 = vrot.slane %v2390_v16, 4 }
0x11dd   :  { %v2409_v39 = vsel %vm313_vm4, %v2250_v12, %v2407_v40  ;;  %vm2460_vm4 = vcmask 916480  }
0x11de   :  { %v2462_v18 = vsel %vm430_vm6, %v2409_v39, %v2438_v11 }
0x11df   :  { %v2464_v6 = vsel %vm2463_vm0, %v2462_v18, %v2439_v1 }
0x11e0   :  { %v2466_v10 = vsel %vm2465_vm1, %v2464_v6, 0.0 }
0x11e1   :  { %2468 = vst [vmem:[%s3763_s3 + $0x8] sm:$0xff] %v2466_v10 }
0x11ed   :  { %v2368_v30 = vpop.permute.xlu1 %2367 }
0x11ee   :  { %v2371_v38 = vmul.f32 %v2368_v30, %v3667_v25 }
0x11f0   :  { %v2373_v55 = vadd.f32 %v2371_v38, %v2361_v31 }
0x11f1   :  { %v2442_v34 = vpop.permute.xlu1 %2441 }
0x11f2   :  { %v2456_v17 = vsel %vm130_vm2, %v3344_v21, %v2442_v34  ;;  %2420 = vrot.lane.b32.xlu1 %v2373_v55, %s3119_s22 }
0x11f5   :  { %v2446_v48 = vpop.permute.xlu1 %2445 }
0x11f6   :  { %v2457_v20 = vsel %vm1928_vm11, %v2456_v17, %v2446_v48  ;;  %2418 = vrot.lane.b32.xlu1 %v2372_v19, %s3119_s22 }
0x11f9   :  { %v2450_v23 = vpop.permute.xlu1 %2449 }
0x11fa   :  { %v2459_v25 = vsel %vm2458_vm3, %v2457_v20, %v2450_v23  ;;  %2453 = vrot.lane.b32.xlu1 %v1471_v46, %s3121_s27 }
0x120c   :  { %v2417_v47 = vpop.permute.xlu0 %2416 }
0x120d   :  { %v2427_v21 = vsel %vm130_vm2, %v3205_v28, %v2417_v47 }
0x120e   :  { %v2431_v49 = vsel %vm1928_vm11, %v2427_v21, 0.0 }
0x120f   :  { %2435 = vst [vmem:[%s3764_s2 + $0x8] sm:$0xff] %v2431_v49 }
0x1219   :  { %v2415_v4 = vpop.permute.xlu1 %2414 }
0x121a   :  { %v2426_v50 = vsel %vm130_vm2, %v3201_v26, %v2415_v4 }
0x121b   :  { %v2430_v22 = vsel %vm1928_vm11, %v2426_v50, 0.0 }
0x121c   :  { %2434 = vst [vmem:[%s3764_s2] sm:$0xff] %v2430_v22 }
0x1264   :  { %v2421_v0 = vpop.permute.xlu1 %2420 }
0x1265   :  { %v2429_v28 = vsel %vm130_vm2, %v3222_v35, %v2421_v0 }
0x1266   :  { %v2433_v51 = vsel %vm1928_vm11, %v2429_v28, 0.0 }
0x1267   :  { %2437 = vst [vmem:[%s3764_s2 + $0x18] sm:$0xff] %v2433_v51 }
0x1268   :  { %v2419_v41 = vpop.permute.xlu1 %2418 }
0x1269   :  { %v2428_v26 = vsel %vm130_vm2, %v3217_v33, %v2419_v41 }
0x126a   :  { %v2432_v62 = vsel %vm1928_vm11, %v2428_v26, 0.0 }
0x126b   :  { %2436 = vst [vmem:[%s3764_s2 + $0x10] sm:$0xff] %v2432_v62 }
0x126c   :  { %v2454_v56 = vpop.permute.xlu1 %2453 }
0x126d   :  { %v2461_v44 = vsel %vm2460_vm4, %v2459_v25, %v2454_v56 }
0x126e   :  { %2467 = vst [vmem:[%s3763_s3] sm:$0xff] %v2461_v44 }

</bundles_post_ra>
